<compile_context>
chip_gen: v7x
topology: tpu7x:2x2x1
jax: 0.10.0
libtpu: 0.0.40
codegen_flags: <defaults>
</compile_context>

<pallas_src>
import math

import jax
import jax.numpy as jnp
from jax.experimental import pallas as pl
from jax.experimental.pallas import tpu as pltpu


def _pose_geo_kernel(xyz_ref, x_ref, scale_ref, phase_ref, o_ref):
    # xyz_ref : (1, in_dim, TN)      compact xyz tile
    # x_ref   : (1, out_dim, TN)     feature tile
    # scale_ref / phase_ref : (2*feat_dim, 1) per-inner-channel constants
    # o_ref   : (1, out_dim, TN)
    xyz = xyz_ref[...].astype(jnp.float32)            # (1, in_dim, TN)
    x = x_ref[...].astype(jnp.float32)                # (1, out_dim, TN)

    scale = scale_ref[...][None, None, :, :]          # (1, 1, 2F, 1)
    phase = phase_ref[...][None, None, :, :]          # (1, 1, 2F, 1)

    # Expand along a new sublane axis of size 2*feat_dim, then merge it with
    # the xyz-coordinate axis to recover the out_dim channel order
    # c = d * 2F + 2*f + s  (s=0 -> sin, s=1 -> cos == sin(+pi/2)).
    t = xyz[:, :, None, :] * scale + phase            # (1, in_dim, 2F, TN)
    pos = jnp.sin(t).reshape(x.shape)                 # (1, out_dim, TN)

    o_ref[...] = ((x + pos) * pos).astype(o_ref.dtype)


def _round_up(x, m):
    return (x + m - 1) // m * m


def pose_geo(knn_xyz, knn_x, *, in_dim, out_dim, alpha, beta, tile_n=4096):
    B, in_dim_, G, K = knn_xyz.shape
    assert in_dim_ == in_dim
    assert knn_x.shape == (B, out_dim, G, K)
    assert out_dim % (in_dim * 2) == 0, "out_dim must be a multiple of 2*in_dim"
    feat_dim = out_dim // (in_dim * 2)
    two_f = 2 * feat_dim
    N = G * K

    # Stream inputs in their native dtype (no wrapper-side f32 copy).
    xyz = knn_xyz.reshape(B, in_dim, N)
    x = knn_x.reshape(B, out_dim, N)

    # Large lane tiles (multiple of 128); pl.cdiv grid so N need not divide.
    tile_n = min(tile_n, _round_up(N, 128))
    grid = (B, pl.cdiv(N, tile_n))

    # Per-inner-channel constants: j in [0, 2F), f = j//2, s = j%2.
    j = jnp.arange(two_f)
    f = (j // 2).astype(jnp.float32)
    scale = (jnp.float32(beta)
             / jnp.power(jnp.float32(alpha), f / feat_dim)).reshape(two_f, 1)
    phase = ((j % 2).astype(jnp.float32)
             * jnp.float32(math.pi / 2)).reshape(two_f, 1)

    out = pl.pallas_call(
        _pose_geo_kernel,
        out_shape=jax.ShapeDtypeStruct((B, out_dim, N), knn_x.dtype),
        grid_spec=pltpu.PrefetchScalarGridSpec(
            num_scalar_prefetch=0,
            grid=grid,
            in_specs=[
                pl.BlockSpec((1, in_dim, tile_n), lambda b, n: (b, 0, n)),
                pl.BlockSpec((1, out_dim, tile_n), lambda b, n: (b, 0, n)),
                pl.BlockSpec((two_f, 1), lambda b, n: (0, 0)),
                pl.BlockSpec((two_f, 1), lambda b, n: (0, 0)),
            ],
            out_specs=pl.BlockSpec((1, out_dim, tile_n), lambda b, n: (b, 0, n)),
        ),
        compiler_params=pltpu.CompilerParams(
            dimension_semantics=("parallel", "parallel")),
    )(xyz, x, scale, phase)
    return out.reshape(B, out_dim, G, K)


def pose_geo_ref(knn_xyz, knn_x, *, in_dim, out_dim, alpha, beta):
    """Pure-JAX transcription of the PyTorch forward (for verification)."""
    B, _, G, K = knn_xyz.shape
    feat_dim = out_dim // (in_dim * 2)
    feat_range = jnp.arange(feat_dim, dtype=jnp.float32)
    dim_embed = jnp.power(jnp.float32(alpha), feat_range / feat_dim)
    div_embed = (beta * knn_xyz[..., None]) / dim_embed          # (B, in_dim, G, K, F)
    sin_embed = jnp.sin(div_embed)
    cos_embed = jnp.cos(div_embed)
    position_embed = jnp.stack([sin_embed, cos_embed], axis=5)   # (B, in_dim, G, K, F, 2)
    position_embed = position_embed.reshape(B, in_dim, G, K, feat_dim * 2)
    position_embed = jnp.transpose(position_embed, (0, 1, 4, 2, 3)).reshape(B, out_dim, G, K)
    knn_x_w = knn_x + position_embed
    knn_x_w = knn_x_w * position_embed
    return knn_x_w


if __name__ == "__main__":
    # Module hyper-parameters (no learned weights in PosE_Geo).
    IN_DIM, OUT_DIM = 4, 32          # feat_dim = 32 / (4*2) = 4, 2F = 8
    ALPHA, BETA = 1000.0, 100.0
    B, G, K = 2, 16, 16

    key = jax.random.PRNGKey(0)
    k1, k2 = jax.random.split(key)
    knn_xyz = jax.random.normal(k1, (B, IN_DIM, G, K), dtype=jnp.float32)
    knn_x = jax.random.normal(k2, (B, OUT_DIM, G, K), dtype=jnp.float32)

    out = pose_geo(knn_xyz, knn_x, in_dim=IN_DIM, out_dim=OUT_DIM,
                   alpha=ALPHA, beta=BETA)
    out = jax.block_until_ready(out)

    ref = pose_geo_ref(knn_xyz, knn_x, in_dim=IN_DIM, out_dim=OUT_DIM,
                       alpha=ALPHA, beta=BETA)
    assert out.shape == (B, OUT_DIM, G, K)
    assert jnp.allclose(out, ref, atol=2e-3, rtol=2e-3), \
        f"max abs err = {jnp.max(jnp.abs(out - ref))}"

    print("KERNEL_OK")
</pallas_src>

<mosaic_0001>
module attributes {stable_mosaic.version = 11 : i64} {
  func.func @_pose_geo_kernel(%arg0: i32, %arg1: i32, %arg2: memref<1x4x256xf32, #tpu.memory_space<vmem>>, %arg3: memref<1x32x256xf32, #tpu.memory_space<vmem>>, %arg4: memref<8x1xf32, #tpu.memory_space<vmem>>, %arg5: memref<8x1xf32, #tpu.memory_space<vmem>>, %arg6: memref<1x32x256xf32, #tpu.memory_space<vmem>>) attributes {dimension_semantics = [#tpu.dimension_semantics<parallel>, #tpu.dimension_semantics<parallel>], iteration_bounds = array<i64: 2, 1>, scalar_prefetch = 0 : i64, scratch_operands = 0 : i64, tpu.core_type = #tpu.core_type<tc>, window_params = [{transform_indices = @transform_0, window_bounds = array<i64: 1, 4, 256>}, {transform_indices = @transform_1, window_bounds = array<i64: 1, 32, 256>}, {pipeline_mode = #tpu.pipeline_mode<synchronous>, transform_indices = @transform_2, window_bounds = array<i64: 8, 1>}, {pipeline_mode = #tpu.pipeline_mode<synchronous>, transform_indices = @transform_3, window_bounds = array<i64: 8, 1>}, {transform_indices = @transform_4, window_bounds = array<i64: 1, 32, 256>}]} {
    %c0 = arith.constant 0 : index
    %c0_0 = arith.constant 0 : index
    %c0_1 = arith.constant 0 : index
    %0 = vector.load %arg2[%c0, %c0_0, %c0_1] : memref<1x4x256xf32, #tpu.memory_space<vmem>>, vector<1x4x256xf32>
    %c0_2 = arith.constant 0 : index
    %c0_3 = arith.constant 0 : index
    %c0_4 = arith.constant 0 : index
    %1 = vector.load %arg3[%c0_2, %c0_3, %c0_4] : memref<1x32x256xf32, #tpu.memory_space<vmem>>, vector<1x32x256xf32>
    %c0_5 = arith.constant 0 : index
    %c0_6 = arith.constant 0 : index
    %2 = vector.load %arg4[%c0_5, %c0_6] : memref<8x1xf32, #tpu.memory_space<vmem>>, vector<8x1xf32>
    %3 = vector.shape_cast %2 : vector<8x1xf32> to vector<1x1x8x1xf32>
    %c0_7 = arith.constant 0 : index
    %c0_8 = arith.constant 0 : index
    %4 = vector.load %arg5[%c0_7, %c0_8] : memref<8x1xf32, #tpu.memory_space<vmem>>, vector<8x1xf32>
    %5 = vector.shape_cast %4 : vector<8x1xf32> to vector<1x1x8x1xf32>
    %6 = vector.shape_cast %0 : vector<1x4x256xf32> to vector<1x4x1x256xf32>
    %7 = vector.broadcast %6 : vector<1x4x1x256xf32> to vector<1x4x8x256xf32>
    %8 = vector.broadcast %3 : vector<1x1x8x1xf32> to vector<1x4x8x256xf32>
    %9 = arith.mulf %7, %8 : vector<1x4x8x256xf32>
    %10 = vector.broadcast %5 : vector<1x1x8x1xf32> to vector<1x4x8x256xf32>
    %11 = arith.addf %9, %10 : vector<1x4x8x256xf32>
    %12 = math.sin %11 : vector<1x4x8x256xf32>
    %13 = vector.shape_cast %12 : vector<1x4x8x256xf32> to vector<1x32x256xf32>
    %14 = arith.addf %1, %13 : vector<1x32x256xf32>
    %15 = arith.mulf %14, %13 : vector<1x32x256xf32>
    %c0_9 = arith.constant 0 : index
    %c0_10 = arith.constant 0 : index
    %c0_11 = arith.constant 0 : index
    %16 = vector.load %arg6[%c0_9, %c0_10, %c0_11] : memref<1x32x256xf32, #tpu.memory_space<vmem>>, vector<1x32x256xf32>
    tpu.vector_store %arg6[%c0_9, %c0_10, %c0_11], %15 {strides = array<i32>} : memref<1x32x256xf32, #tpu.memory_space<vmem>>, vector<1x32x256xf32>,
    return
  }
  func.func @transform_0(%arg0: i32, %arg1: i32) -> (i32, i32, i32) {
    %c0_i32 = arith.constant 0 : i32
    %c0_i32_0 = arith.constant 0 : i32
    return %arg0, %c0_i32, %arg1 : i32, i32, i32
  }
  func.func @transform_1(%arg0: i32, %arg1: i32) -> (i32, i32, i32) {
    %c0_i32 = arith.constant 0 : i32
    %c0_i32_0 = arith.constant 0 : i32
    return %arg0, %c0_i32, %arg1 : i32, i32, i32
  }
  func.func @transform_2(%arg0: i32, %arg1: i32) -> (i32, i32) {
    %c0_i32 = arith.constant 0 : i32
    %c0_i32_0 = arith.constant 0 : i32
    %c0_i32_1 = arith.constant 0 : i32
    return %c0_i32, %c0_i32_0 : i32, i32
  }
  func.func @transform_3(%arg0: i32, %arg1: i32) -> (i32, i32) {
    %c0_i32 = arith.constant 0 : i32
    %c0_i32_0 = arith.constant 0 : i32
    %c0_i32_1 = arith.constant 0 : i32
    return %c0_i32, %c0_i32_0 : i32, i32
  }
  func.func @transform_4(%arg0: i32, %arg1: i32) -> (i32, i32, i32) {
    %c0_i32 = arith.constant 0 : i32
    %c0_i32_0 = arith.constant 0 : i32
    return %arg0, %c0_i32, %arg1 : i32, i32, i32
  }
}

</mosaic_0001>

<bundles_post_ra>
// kernel: tpu_custom_call.1
= control target key start
LH: loop header
LB: loop body
LE: loop exit
PB: predicated region body
PF: predicated region fallthrough
CT: control target
= control target key end

     0   :  { %9 = vsyncpa [#allocation3], 0  ;;  %s2718_s0 = inlined_call_operand.vmem [shape: f32[2,4,256], index: 0, kind: input, shape index: {}]   ;;  %s2719_s1 = inlined_call_operand.hbm [shape: f32[2,32,256], index: 1, kind: input, shape index: {}]   ;;  %s2720_s2 = inlined_call_operand.vmem [shape: f32[8,1], index: 2, kind: input, shape index: {}]   ;;  %s2721_s3 = inlined_call_operand.vmem [shape: f32[8,1], index: 3, kind: input, shape index: {}]   ;;  %s2722_s4 = inlined_call_operand.hbm [shape: f32[2,32,256], index: 4, kind: output, shape index: {}]  }
   0x1   :  { %11 = vsyncpa [#allocation3 + $0x1], 0 }
   0x2   :  { %12 = vsyncpa [#allocation4], 0 }
   0x3   :  { %14 = vsyncpa [#allocation4 + $0x1], 0  ;;  %s1696_s15 = smov 0   ;;  %s1698_s16 = smov 0  }
   0x4   :  { %s1700_s17 = smov 0   ;;  %s1702_s18 = smov 0  }
   0x5   :  { %s1704_s19 = smov 0   ;;  %s1706_s20 = smov 0  }
   0x6 LB: > { %s1351_s21 = sadd.s32 4294967295, %s1655_s20   ;;  %s1352_s22 = sadd.s32 4294967294, %s1655_s20   ;;  %s1655_s20 = sphi %s1706_s20, %s20_s20   ;;  %s1651_s19 = sphi %s1704_s19, %s2749_s19   ;;  %s1647_s18 = sphi %s1702_s18, %s2748_s18   ;;  %s1643_s17 = sphi %s1700_s17, %s2747_s17   ;;  %s1639_s16 = sphi %s1698_s16, %s2746_s16   ;;  %s1635_s15 = sphi %s1696_s15, %s2745_s15  }
   0x7   : > { %s32_s23 = sadd.s32 1, %s1651_s19  ;;  %s69_s24 = sadd.s32 1, %s1643_s17 }
   0x8   : > { %p34_p0 = scmp.ge.s32.totalorder %s32_s23, 2  ;;  %p76_p1 = scmp.ne.s32.totalorder %s1643_s17, %s1639_s16 }
   0x9   : > { %p77_p2 = scmp.eq.s32.totalorder %s1655_s20, 0  ;;  %p82_p3 = scmp.ne.s32.totalorder %s1639_s16, %s1635_s15 }
   0xa   : > { %s2751_s23 = smov (%p34_p0, %s32_s23), 0  ;;  %p83_p5 = scmp.eq.s32.totalorder %s1351_s21, 0 }
   0xb   : > { %p1737_p4 = por %p77_p2, %p76_p1  ;;  %s64_s26 = ssub.s32 %s1651_s19, %s2751_s23 }
   0xc   : > { %p150_p6 = scmp.eq.s32.totalorder %s1351_s21, 1  ;;  %p67_p7 = scmp.eq.s32.totalorder %s64_s26, 0 }
   0xd   : > { %p1743_p8 = por %p83_p5, %p82_p3  ;;  %p156_p10 = scmp.eq.s32.totalorder %s1352_s22, 1 }
   0xe   : > { %p1747_p9 = por %p150_p6, %p76_p1  ;;  %p1448_p13 = scmp.lt.s32.totalorder %s1655_s20, 2 }
   0xf   : > { %s1752_s29 = scalar_select %p67_p7, %s1643_s17, %s69_s24  }
  0x10   : > { %s2726_s28 = scalar_select %p1747_p9, 1, 0 }
  0x11   : > { %p1754_p11 = por %p156_p10, %p82_p3  ;;  %s195_s5 = sand.u32 1, %s1643_s17  }
  0x12   : > { %s1355_s6 = sshll.u32 %s195_s5, 6  ;;  %s1401_s7 = sshll.u32 %s1651_s19, 10 }
  0x13   : > { %s2727_s30 = scalar_select %p1754_p11, 1, 0 }
  0x14   : > { %s1765_s10 = scalar_lea.hbm %s2719_s1, %s1401_s7  ;;  %s199_s11 = scalar_lea.vmem [#allocation2], %s1355_s6 }
  0x15   : > { %s208_s12 = sshll.u32 %s199_s11, 4  ;;  %p1771_p0 = pnand %p1448_p13, %p1737_p4  ;;  %s1767_s12 = int_to_ptr.vmem [resolvable:$true] %s208_s12 }
  0x16   : > { %s1776_s14 = scalar_lea.sflag [#allocation3], %s195_s5  ;;  %s1543_s21 = scalar_lea.hbm %s1765_s10, 1024 }
  0x17   : > { %p1544_p2 = scmp.ne.s32.totalorder %s1765_s10, %s1543_s21  ;;  %p1545_p3 = pneg %p1771_p0 }
  0x18   : > { %s1548_s25 = scalar_lea.hbm %s2719_s1, 2048  ;;  %p1549_p4 = scmp.lt.u32.totalorder %s1765_s10, %s2719_s1 }
  0x19   : > { %p1546_p5 = pnand %p1545_p3, %p1544_p2  ;;  %p1550_p7 = scmp.lt.u32.totalorder %s1548_s25, %s1543_s21 }
  0x1a   : > { %p1552_p13 = scmp.lt.u32.totalorder %s1543_s21, %s1765_s10 }
  0x1b   : > { %p1547_p6 = pneg %p1546_p5  ;;  %p1551_p10 = por %p1550_p7, %p1549_p4 }
  0x1d   : > { %p1553_p12 = por %p1552_p13, %p1551_p10 }
  0x1f   : > { %p1554_p1 = pnand %p1553_p12, %p1547_p6 }
  0x21   : > { %1557 = shalt.err (!%p1554_p1)
}
  0x22   : > { %s1558_s5 = scalar_lea.vmem %s1767_s12, 1024  ;;  %s1657_s7 = smov [#allocation2]  }
  0x23   : > { %p1559_p2 = scmp.ne.s32.totalorder %s1767_s12, %s1558_s5  ;;  %s1563_s8 = sshll.u32 %s1657_s7, 4  ;;  %s1564_s8 = int_to_ptr.vmem [resolvable:$false] %s1563_s8 }
  0x24   : > { %s1565_s9 = scalar_lea.vmem %s1564_s8, 2048  ;;  %p1566_p9 = scmp.lt.s32.totalorder %s1767_s12, %s1564_s8 }
  0x25   : > { %p1561_p5 = pnand %p1559_p2, %p1545_p3  ;;  %p1567_p4 = scmp.lt.s32.totalorder %s1565_s9, %s1558_s5 }
  0x27   : > { %p1562_p11 = pneg %p1561_p5  ;;  %p1568_p7 = por %p1567_p4, %p1566_p9 }
  0x29   : > { %p1569_p10 = pnand %p1568_p7, %p1562_p11 }
  0x2b   : > { %1572 = shalt.err (!%p1569_p10)
}
  0x2c   : > { %s1658_s11 = smov 256   ;;  %s1659_s21 = smov 16  }
  0x2d   : > { %1443 = dma.hbm_to_vmem [thread:$0]  (!%p1771_p0), %s1765_s10, 1024, %s1767_s12, %s1776_s14, %s1658_s11, %s1658_s11, %s1659_s21  }
  0x2e   : > { %p216_p12 = scmp.lt.s32.totalorder %s1655_s20, 3  ;;  %p2729_p1 = scmp.ge.s32.totalorder %s1655_s20, 1 }
  0x30   : > { %p217_p3 = pnand %p2729_p1, %p216_p12 }
  0x31   : > { %s1808_s22 = sand.u32 (!%p217_p3), 1, %s1639_s16  }
  0x32   : > { %220 = sbr.rel (%p217_p3) target bundleno = 454 (0x1c6), region = 36  ;;  %s1359_s24 = sshll.u32 (!%p217_p3), %s1808_s22, 6 }
  0x33   : > { %s223_s25 = scalar_lea.sflag (!%p217_p3), [#allocation3], %s1808_s22  ;;  %s1814_s26 = scalar_lea.vmem (!%p217_p3), [#allocation2], %s1359_s24 }
  0x39   : > { %1626 = dma.done.wait (%p1743_p8), %s223_s25, 1024  }
  0x3a   : > { %1628 = vsyncadd (%p1743_p8), %s223_s25, 4294966272  ;;  %v1660_v0 = vmov 0   ;;  %v281_v1 = vld [vmem:[%s2720_s2] sm:$0xff]  ;;  %p261_p9 = scmp.lt.s32.totalorder %s1647_s18, 1  ;;  %v1661_v3 = vmov 1966171168   ;;  %v295_v5 = vlaneseq }
  0x3b   : > { %1510 = vset.pattern.permute.xlu0 %v1660_v0  ;;  %v282_v2 = vld [vmem:[%s2721_s3] sm:$0xff]  ;;  %v293_v4 = vunpack.c.l.s4 %v1661_v3  ;;  %v1662_v58 = vmov 683565275   ;;  %v1663_v62 = vmov 2475754826   ;;  %s2542_s9 = scalar_lea.vmem [#allocation5], %s1359_s24 }
  0x3c   : > { %350 = vperm.xlu0 %1510, %v281_v1   ;;  %s262_s6 = scalar_select %p261_p9, %s1647_s18, 1  ;;  %v296_v7 = vshrl.u32 %v295_v5, 7  ;;  %v1664_v0 = vmov 2131351028  }
  0x3d   : > { %v294_v6 = vunpack.c.0.s8 %v293_v4  ;;  %v1666_v4 = vmov 920167782   ;;  %s1403_s11 = sshll.u32 %s1647_s18, 10  ;;  %s1246_s21 = sshll.u32 %s2542_s9, 4  ;;  %s2668_s21 = int_to_ptr.vmem [resolvable:$true] %s1246_s21 }
  0x3e   : > { %s1402_s5 = sshll.u32 %s262_s6, 3  ;;  %v1833_v13 = vsub.s32 1, %v296_v7  ;;  %v1835_v14 = vsub.s32 0, %v296_v7  ;;  %s2666_s10 = scalar_lea.hbm %s2722_s4, %s1403_s11 }
  0x3f   : > { %s268_s8 = scalar_lea.vmem %s2718_s0, %s1402_s5  ;;  %v297_v10 = vsub.s32 %v294_v6, %v296_v7  ;;  %s1573_s12 = scalar_lea.vmem %s2668_s21, 1024 }
  0x40   : > { %363 = vperm.xlu0 %1510, %v282_v2   ;;  %v1363_v8 = vld.sshfl [vmem:[%s268_s8] sm:$0xff pattern:$0x75316420]  ;;  %v1665_v2 = vmov 2102212464   ;;  %p1574_p8 = scmp.ne.s32.totalorder %s2668_s21, %s1573_s12  ;;  %p2742_p11 = scmp.ne.s32.totalorder %s2726_s28, 0 }
  0x41   : > { %v291_v9 = vcombine.high %v1363_v8, %v1363_v8  ;;  %v1837_v15 = vrot.slane %v1363_v8, %v297_v10  ;;  %s1668_s18 = smov [#allocation5]  }
  0x42   : > { %p1575_p0 = pnand %p1574_p8, %p2742_p11  ;;  %s1577_s13 = sshll.u32 %s1668_s18, 4  ;;  %s1578_s13 = int_to_ptr.vmem [resolvable:$false] %s1577_s13 }
  0x43   : > { %v305_v11 = vrot.slane %v291_v9, %v297_v10  ;;  %v311_v17 = vrot.slane %v1837_v15, %v1835_v14  ;;  %v315_v18 = vrot.slane %v1837_v15, %v1833_v13  ;;  %s1579_s14 = scalar_lea.vmem %s1578_s13, 2048  ;;  %p1580_p13 = scmp.lt.s32.totalorder %s2668_s21, %s1578_s13 }
  0x44   : > { %p1576_p6 = pneg %p1575_p0  ;;  %p1581_p2 = scmp.lt.s32.totalorder %s1579_s14, %s1573_s12 }
  0x45   : > { %v1831_v12 = vcombine.high %v305_v11, %v305_v11  ;;  %v319_v20 = vrot.slane %v305_v11, %v1835_v14  ;;  %v323_v42 = vrot.slane %v305_v11, %v1833_v13  ;;  %v1667_v11 = vmov 1326507024  }
  0x46   : > { %p1582_p5 = por %p1581_p2, %p1580_p13 }
  0x47   : > { %v339_v16 = vrot.slane %v1831_v12, %v1833_v13 }
  0x48   : > { %p1583_p4 = pnand %p1582_p5, %p1576_p6 }
  0xbb   : > { %v1845_v19 = vpop.permute.xlu0 %350 }
  0xbc   : > { %v360_v21 = vmul.f32 %v1845_v19, %v339_v16  ;;  %v353_v22 = vmul.f32 %v1845_v19, %v311_v17  ;;  %v354_v23 = vmul.f32 %v1845_v19, %v315_v18  ;;  %v355_v25 = vmul.f32 %v1845_v19, %v319_v20 }
  0xbd   : > { %v1877_v49 = vmul.f32 %v1845_v19, %v323_v42 }
  0xbf   : > { %v1851_v24 = vpop.permute.xlu0 %363 }
  0xc0   : > { %v1855_v26 = vadd.f32 %v1851_v24, %v353_v22  ;;  %v1858_v27 = vadd.f32 %v1851_v24, %v354_v23  ;;  %v1861_v28 = vadd.f32 %v1851_v24, %v355_v25  ;;  %v1864_v29 = vadd.f32 %v1851_v24, %v360_v21 }
  0xc2   : > { %v374_v30 = vand.u32 2147483647, %v1855_v26  ;;  %v377_v31 = vand.u32 2139095040, %v1855_v26  ;;  %v478_v32 = vand.u32 2147483647, %v1858_v27  ;;  %v481_v33 = vand.u32 2139095040, %v1858_v27 }
  0xc3   : > { %v585_v38 = vand.u32 2139095040, %v1861_v28  ;;  %v582_v55 = vand.u32 2147483647, %v1861_v28 }
  0xc4   : > { %v378_v34 = vshrl.u32 %v377_v31, 23  ;;  %v381_v35 = vand.u32 8388607, %v374_v30  ;;  %v482_v36 = vshrl.u32 %v481_v33, 23  ;;  %v485_v37 = vand.u32 8388607, %v478_v32 }
  0xc5   : > { %v586_v41 = vshrl.u32 %v585_v38, 23 }
  0xc6   : > { %v1364_v39 = vadd.s32 4294967169, %v378_v34  ;;  %v1368_v40 = vadd.s32 4294967169, %v482_v36  ;;  %v382_v44 = vor.u32 8388608, %v381_v35  ;;  %v486_v45 = vor.u32 8388608, %v485_v37 }
  0xc7   : > { %v1372_v47 = vadd.s32 4294967169, %v586_v41 }
  0xc8   : > { %v384_v43 = vadd.s32 1, %v1364_v39  ;;  %v488_v46 = vadd.s32 1, %v1368_v40  ;;  %v1879_v53 = vshll.u32 %v382_v44, 8  ;;  %v1881_v54 = vshll.u32 %v486_v45, 8 }
  0xc9   : > { %v1884_v56 = vadd.s32 1, %v1372_v47 }
  0xca   : > { %vm385_vm0 = vcmp.gt.s32.totalorder %v384_v43, 0  ;;  %vm489_vm1 = vcmp.gt.s32.totalorder %v488_v46, 0 }
  0xcb   : > { %v386_v48 = vsel %vm385_vm0, %v384_v43, 0  ;;  %v490_v52 = vsel %vm489_vm1, %v488_v46, 0  ;;  %vm593_vm6 = vcmp.gt.s32.totalorder %v1884_v56, 0 }
  0xcc   : > { %v387_v50 = vshrl.u32 %v386_v48, 5  ;;  %v388_v51 = vand.u32 31, %v386_v48  ;;  %v1887_v60 = vshrl.u32 %v490_v52, 5  ;;  %v492_v61 = vand.u32 31, %v490_v52 }
  0xce   : > { %v389_v57 = vsub.s32 32, %v388_v51  ;;  %v391_v59 = vshll.u32 %v1662_v58, %v388_v51  ;;  %v394_v63 = vshll.u32 %v1663_v62, %v388_v51  ;;  %v397_v1 = vshll.u32 %v1664_v0, %v388_v51 }
  0xcf   : > { %v400_v3 = vshll.u32 %v1665_v2, %v388_v51  ;;  %v403_v5 = vshll.u32 %v1666_v4, %v388_v51  ;;  %vm406_vm2 = vcmp.lt.s32.totalorder %v387_v50, 1  ;;  %vm407_vm3 = vcmp.lt.s32.totalorder %v387_v50, 2 }
  0xd0   : > { %v392_v6 = vshrl.u32 %v1663_v62, %v389_v57  ;;  %v395_v7 = vshrl.u32 %v1664_v0, %v389_v57  ;;  %v398_v8 = vshrl.u32 %v1665_v2, %v389_v57  ;;  %v390_v9 = vshrl.u32 %v1662_v58, %v389_v57 }
  0xd1   : > { %v401_v10 = vshrl.u32 %v1666_v4, %v389_v57  ;;  %v404_v16 = vshrl.u32 %v1667_v11, %v389_v57  ;;  %v493_v21 = vsub.s32 32, %v492_v61  ;;  %vm408_vm4 = vcmp.lt.s32.totalorder %v387_v50, 3 }
  0xd2   : > { %v393_v17 = vor.u32 %v392_v6, %v391_v59  ;;  %v396_v18 = vor.u32 %v395_v7, %v394_v63  ;;  %v399_v20 = vor.u32 %v398_v8, %v397_v1  ;;  %vm409_vm5 = vcmp.lt.s32.totalorder %v387_v50, 4 }
  0xd3   : > { %v402_v22 = vor.u32 %v401_v10, %v400_v3  ;;  %v405_v23 = vor.u32 %v404_v16, %v403_v5  ;;  %v495_v38 = vshll.u32 %v1662_v58, %v492_v61  ;;  %v496_v41 = vshrl.u32 %v1663_v62, %v493_v21 }
  0xd4   : > { %v410_v25 = vsel %vm406_vm2, %v390_v9, %v393_v17  ;;  %v411_v31 = vsel %vm409_vm5, %v399_v20, 2102212464  ;;  %v414_v33 = vsel %vm406_vm2, %v393_v17, %v396_v18  ;;  %v418_v34 = vsel %vm406_vm2, %v396_v18, %v399_v20 }
  0xd5   : > { %v412_v35 = vsel %vm408_vm4, %v396_v18, %v411_v31  ;;  %v415_v36 = vsel %vm409_vm5, %v402_v22, 920167782  ;;  %v419_v37 = vsel %vm409_vm5, %v405_v23, 1326507024  ;;  %v498_v42 = vshll.u32 %v1663_v62, %v492_v61 }
  0xd6   : > { %v416_v39 = vsel %vm408_vm4, %v399_v20, %v415_v36  ;;  %v420_v40 = vsel %vm408_vm4, %v402_v22, %v419_v37  ;;  %v413_v43 = vsel %vm407_vm3, %v410_v25, %v412_v35  ;;  %v499_v46 = vshrl.u32 %v1664_v0, %v493_v21 }
  0xd7   : > { %v417_v44 = vsel %vm407_vm3, %v414_v33, %v416_v39  ;;  %v421_v45 = vsel %vm407_vm3, %v418_v34, %v420_v40  ;;  %v497_v57 = vor.u32 %v496_v41, %v495_v38  ;;  %v501_v63 = vshll.u32 %v1664_v0, %v492_v61 }
  0xd8   : > { %v1911_v47 = vmul.u32.u64.low %v1879_v53, %v421_v45  ;;  %v1912_v48 = vmul.u32.u64.high %v1879_v53, %v421_v45, %v1911_v47  ;;  %v1915_v51 = vmul.u32.u64.low %v1879_v53, %v417_v44  ;;  %v1916_v52 = vmul.u32.u64.high %v1879_v53, %v417_v44, %v1915_v51 }
  0xd9   : > { %v500_v59 = vor.u32 %v499_v46, %v498_v42  ;;  %v502_v1 = vshrl.u32 %v1665_v2, %v493_v21  ;;  %v494_v50 = vshrl.u32 %v1662_v58, %v493_v21  ;;  %v504_v3 = vshll.u32 %v1665_v2, %v492_v61 }
  0xda   : > { %v505_v5 = vshrl.u32 %v1666_v4, %v493_v21  ;;  %v508_v6 = vshrl.u32 %v1667_v11, %v493_v21  ;;  %v429_v7 = vmul.u32 %v1879_v53, %v413_v43  ;;  %v507_v9 = vshll.u32 %v1666_v4, %v492_v61 }
  0xdb   : > { %v503_v8 = vor.u32 %v502_v1, %v501_v63  ;;  %vm510_vm7 = vcmp.lt.s32.totalorder %v1887_v60, 1  ;;  %vm431_vm8 = vc.u32 %v1912_v48, %v1915_v51  ;;  %v432_v10 = vadd.s32 1, %v1916_v52 }
  0xdc   : > { %v506_v16 = vor.u32 %v505_v5, %v504_v3  ;;  %vm511_vm9 = vcmp.lt.s32.totalorder %v1887_v60, 2  ;;  %v509_v17 = vor.u32 %v508_v6, %v507_v9  ;;  %vm512_vm10 = vcmp.lt.s32.totalorder %v1887_v60, 3 }
  0xdd   : > { %vm513_vm11 = vcmp.lt.s32.totalorder %v1887_v60, 4  ;;  %v518_v18 = vsel %vm510_vm7, %v497_v57, %v500_v59  ;;  %v433_v53 = vsel %vm431_vm8, %v432_v10, %v1916_v52  ;;  %v522_v21 = vsel %vm510_vm7, %v500_v59, %v503_v8 }
  0xde   : > { %v515_v20 = vsel %vm513_vm11, %v503_v8, 2102212464  ;;  %v519_v61 = vsel %vm513_vm11, %v506_v16, 920167782  ;;  %v434_v22 = vadd.s32 %v433_v53, %v429_v7  ;;  %v514_v23 = vsel %vm510_vm7, %v494_v50, %v497_v57 }
  0xdf   : > { %v520_v25 = vsel %vm512_vm10, %v503_v8, %v519_v61  ;;  %v523_v31 = vsel %vm513_vm11, %v509_v17, 1326507024  ;;  %v516_v33 = vsel %vm512_vm10, %v500_v59, %v515_v20  ;;  %v594_v36 = vsel %vm593_vm6, %v1884_v56, 0 }
  0xe0   : > { %v521_v34 = vsel %vm511_vm9, %v518_v18, %v520_v25  ;;  %v524_v35 = vsel %vm512_vm10, %v506_v16, %v523_v31  ;;  %v435_v37 = vadd.s32 536870912, %v434_v22  ;;  %v1949_v41 = vadd.f32 %v1851_v24, %v1877_v49 }
  0xe1   : > { %v525_v38 = vsel %vm511_vm9, %v522_v21, %v524_v35  ;;  %v1943_v39 = vmul.u32.u64.low %v1881_v54, %v521_v34  ;;  %v1944_v40 = vmul.u32.u64.high %v1881_v54, %v521_v34, %v1943_v39  ;;  %v1957_v56 = vcombine.high %v1837_v15, %v1837_v15 }
  0xe2   : > { %v1952_v42 = vmul.u32.u64.low %v1881_v54, %v525_v38  ;;  %v1953_v43 = vmul.u32.u64.high %v1881_v54, %v525_v38, %v1952_v42  ;;  %v1959_v44 = vshrl.u32 %v435_v37, 30  ;;  %v517_v45 = vsel %vm511_vm9, %v514_v23, %v516_v33 }
  0xe3   : > { %v596_v46 = vand.u32 31, %v594_v36  ;;  %v536_v52 = vadd.s32 1, %v1944_v40  ;;  %v589_v49 = vand.u32 8388607, %v582_v55  ;;  %v533_v59 = vmul.u32 %v1881_v54, %v517_v45 }
  0xe4   : > { %v437_v47 = vshll.u32 %v1959_v44, 30  ;;  %vm535_vm12 = vc.u32 %v1953_v43, %v1943_v39  ;;  %v689_v15 = vand.u32 2139095040, %v1949_v41  ;;  %v327_v60 = vrot.slane %v1957_v56, %v1835_v14 }
  0xe5   : > { %v597_v57 = vsub.s32 32, %v596_v46  ;;  %v537_v1 = vsel %vm535_vm12, %v536_v52, %v1944_v40  ;;  %v331_v50 = vrot.slane %v1957_v56, %v1833_v13  ;;  %v335_v3 = vrot.slane %v1831_v12, %v1835_v14 }
  0xe6   : > { %v1973_v63 = vsub.s32 %v434_v22, %v437_v47  ;;  %v538_v5 = vadd.s32 %v537_v1, %v533_v59  ;;  %v590_v7 = vor.u32 8388608, %v589_v49  ;;  %v1984_v16 = vshrl.u32 %v594_v36, 5 }
  0xe7   : > { %v600_v54 = vshrl.u32 %v1663_v62, %v597_v57  ;;  %v603_v8 = vshrl.u32 %v1664_v0, %v597_v57  ;;  %v606_v9 = vshrl.u32 %v1665_v2, %v597_v57  ;;  %v599_v17 = vshll.u32 %v1662_v58, %v596_v46 }
  0xe8   : > { %v440_v6 = vsub.s32 0, %v1973_v63  ;;  %v539_v10 = vadd.s32 536870912, %v538_v5  ;;  %v690_v18 = vshrl.u32 %v689_v15, 23  ;;  %v602_v20 = vshll.u32 %v1663_v62, %v596_v46 }
  0xe9   : > { %v605_v61 = vshll.u32 %v1664_v0, %v596_v46  ;;  %v609_v21 = vshrl.u32 %v1666_v4, %v597_v57  ;;  %v601_v23 = vor.u32 %v600_v54, %v599_v17  ;;  %v608_v25 = vshll.u32 %v1665_v2, %v596_v46 }
  0xea   : > { %v1365_v53 = vmin.u32 %v440_v6, %v1973_v63  ;;  %v1991_v22 = vshrl.u32 %v539_v10, 30  ;;  %v612_v31 = vshrl.u32 %v1667_v11, %v597_v57  ;;  %v604_v34 = vor.u32 %v603_v8, %v602_v20 }
  0xeb   : > { %v607_v35 = vor.u32 %v606_v9, %v605_v61  ;;  %v611_v36 = vshll.u32 %v1666_v4, %v596_v46  ;;  %v430_v37 = vadd.s32 %v1915_v51, %v1912_v48  ;;  %v610_v40 = vor.u32 %v609_v21, %v608_v25 }
  0xec   : > { %v442_v33 = vclz %v1365_v53  ;;  %v541_v38 = vshll.u32 %v1991_v22, 30  ;;  %v1999_v42 = vshll.u32 %v590_v7, 8  ;;  %vm617_vm13 = vcmp.lt.s32.totalorder %v1984_v16, 4 }
  0xed   : > { %v613_v47 = vor.u32 %v612_v31, %v611_v36  ;;  %v1376_v52 = vadd.s32 4294967169, %v690_v18  ;;  %vm614_vm14 = vcmp.lt.s32.totalorder %v1984_v16, 1  ;;  %vm616_vm15 = vcmp.lt.s32.totalorder %v1984_v16, 3 }
  0xee   : > { %v1366_v45 = vadd.s32 4294967294, %v442_v33  ;;  %v2002_v49 = vsub.s32 %v538_v5, %v541_v38  ;;  %v623_v46 = vsel %vm617_vm13, %v610_v40, 920167782  ;;  %vm615_vm1 = vcmp.lt.s32.totalorder %v1984_v16, 2 }
  0xef   : > { %v622_v48 = vsel %vm614_vm14, %v601_v23, %v604_v34  ;;  %v624_v51 = vsel %vm616_vm15, %v607_v35, %v623_v46  ;;  %v598_v1 = vshrl.u32 %v1662_v58, %v597_v57  ;;  %v626_v5 = vsel %vm614_vm14, %v604_v34, %v607_v35 }
  0xf0   : > { %vm1367_vm0 = vcmp.lt.s32.totalorder %v1366_v45, 0  ;;  %v544_v15 = vsub.s32 0, %v2002_v49  ;;  %v619_v7 = vsel %vm617_vm13, %v607_v35, 2102212464  ;;  %v627_v8 = vsel %vm617_vm13, %v613_v47, 1326507024 }
  0xf1   : > { %v445_v59 = vsel %vm1367_vm0, 0, %v1366_v45  ;;  %v625_v17 = vsel %vm615_vm1, %v622_v48, %v624_v51  ;;  %v628_v57 = vsel %vm616_vm15, %v610_v40, %v627_v8  ;;  %v696_v61 = vadd.s32 1, %v1376_v52 }
  0xf2   : > { %v446_v54 = vsub.s32 32, %v445_v59  ;;  %v450_v6 = vsub.s32 4294967266, %v445_v59  ;;  %v447_v9 = vshll.u32 %v1973_v63, %v445_v59  ;;  %v1369_v10 = vmin.u32 %v544_v15, %v2002_v49 }
  0xf3   : > { %v629_v20 = vsel %vm615_vm1, %v626_v5, %v628_v57  ;;  %v357_v21 = vmul.f32 %v1845_v19, %v327_v60  ;;  %v618_v63 = vsel %vm614_vm14, %v598_v1, %v601_v23  ;;  %v620_v31 = vsel %vm616_vm15, %v604_v34, %v619_v7 }
  0xf4   : > { %v448_v18 = vshrl.u32 %v430_v37, %v446_v54  ;;  %v451_v53 = vadd.s32 127, %v450_v6  ;;  %v546_v25 = vclz %v1369_v10  ;;  %vm697_vm2 = vcmp.gt.s32.totalorder %v696_v61, 0 }
  0xf5   : > { %v2035_v36 = vmul.u32.u64.low %v1999_v42, %v629_v20  ;;  %v2036_v38 = vmul.u32.u64.high %v1999_v42, %v629_v20, %v2035_v36  ;;  %v2039_v40 = vmul.u32.u64.low %v1999_v42, %v625_v17  ;;  %v2040_v45 = vmul.u32.u64.high %v1999_v42, %v625_v17, %v2039_v40 }
  0xf6   : > { %v449_v33 = vor.u32 %v448_v18, %v447_v9  ;;  %v452_v35 = vshll.u32 %v451_v53, 23  ;;  %v1370_v37 = vadd.s32 4294967294, %v546_v25  ;;  %v2047_v60 = vmul.f32 %v1845_v19, %v331_v50 }
  0xf7   : > { %v686_v34 = vand.u32 2147483647, %v1949_v41  ;;  %v698_v47 = vsel %vm697_vm2, %v696_v61, 0  ;;  %v460_v52 = vsub.s32 4, %v1959_v44  ;;  %v621_v46 = vsel %vm615_vm1, %v618_v63, %v620_v31 }
  0xf8   : > { %v453_v23 = vor.u32 4788187, %v452_v35  ;;  %vm1371_vm3 = vcmp.lt.s32.totalorder %v1370_v37, 0  ;;  %v700_v48 = vand.u32 31, %v698_v47  ;;  %v534_v59 = vadd.s32 %v1943_v39, %v1953_v43 }
  0xf9   : > { %v549_v15 = vsel %vm1371_vm3, 0, %v1370_v37  ;;  %vm639_vm4 = vc.u32 %v2036_v38, %v2039_v40  ;;  %v456_v13 = vcvt.s32.f32 %v449_v33  ;;  %v640_v1 = vadd.s32 1, %v2040_v45 }
  0xfa   : > { %v454_v51 = vand.u32 2147483647, %v453_v23  ;;  %v550_v56 = vsub.s32 32, %v549_v15  ;;  %v554_v50 = vsub.s32 4294967266, %v549_v15  ;;  %v2059_v5 = vadd.f32 %v1851_v24, %v357_v21 }
  0xfb   : > { %v551_v16 = vshll.u32 %v2002_v49, %v549_v15  ;;  %v637_v54 = vmul.u32 %v1999_v42, %v621_v46  ;;  %v701_v6 = vsub.s32 32, %v700_v48  ;;  %v641_v43 = vsel %vm639_vm4, %v640_v1, %v2040_v45 }
  0xfc   : > { %v457_v7 = vmul.f32 %v456_v13, %v454_v51  ;;  %v552_v8 = vshrl.u32 %v534_v59, %v550_v56  ;;  %v555_v39 = vadd.s32 127, %v554_v50  ;;  %vm376_vm5 = vcmp.lt.s32.totalorder %v1855_v26, 0 }
  0xfd   : > { %v642_v9 = vadd.s32 %v641_v43, %v637_v54  ;;  %v693_v10 = vand.u32 8388607, %v686_v34  ;;  %v704_v17 = vshrl.u32 %v1663_v62, %v701_v6  ;;  %v461_v49 = vsel %vm376_vm5, %v460_v52, %v1959_v44 }
  0xfe   : > { %v553_v57 = vor.u32 %v552_v8, %v551_v16  ;;  %v556_v42 = vshll.u32 %v555_v39, 23  ;;  %v707_v18 = vshrl.u32 %v1664_v0, %v701_v6  ;;  %v2072_v20 = vshrl.u32 %v698_v47, 5 }
  0xff   : > { %v643_v53 = vadd.s32 536870912, %v642_v9  ;;  %v703_v61 = vshll.u32 %v1662_v58, %v700_v48  ;;  %v706_v21 = vshll.u32 %v1663_v62, %v700_v48  ;;  %v458_v25 = vxor.u32 2147483648, %v457_v7 }
 0x100   : > { %vm480_vm6 = vcmp.lt.s32.totalorder %v1858_v27, 0  ;;  %v557_v63 = vor.u32 4788187, %v556_v42  ;;  %v709_v31 = vshll.u32 %v1664_v0, %v700_v48  ;;  %v710_v33 = vshrl.u32 %v1665_v2, %v701_v6 }
 0x101   : > { %v2079_v44 = vshrl.u32 %v643_v53, 30  ;;  %v705_v35 = vor.u32 %v704_v17, %v703_v61  ;;  %v712_v36 = vshll.u32 %v1665_v2, %v700_v48  ;;  %v713_v37 = vshrl.u32 %v1666_v4, %v701_v6 }
 0x102   : > { %v558_v45 = vand.u32 2147483647, %v557_v63  ;;  %v560_v23 = vcvt.s32.f32 %v553_v57  ;;  %v708_v47 = vor.u32 %v707_v18, %v706_v21  ;;  %v716_v52 = vshrl.u32 %v1667_v11, %v701_v6 }
 0x103   : > { %vm2086_vm7 = vcmp.le.f32.partialorder %v374_v30, 0.7853982  ;;  %v645_v51 = vshll.u32 %v2079_v44, 30  ;;  %v694_v59 = vor.u32 8388608, %v693_v10  ;;  %v714_v15 = vor.u32 %v713_v37, %v712_v36 }
 0x104   : > { %v463_v13 = vsel %vm2086_vm7, 0, %v461_v49  ;;  %v561_v56 = vmul.f32 %v560_v23, %v558_v45  ;;  %v711_v50 = vor.u32 %v710_v33, %v709_v31  ;;  %v715_v1 = vshll.u32 %v1666_v4, %v700_v48 }
 0x105   : > { %v459_v16 = vsel %vm376_vm5, %v458_v25, %v457_v7  ;;  %v564_v54 = vsub.s32 4, %v1991_v22  ;;  %v2097_v30 = vsub.s32 %v642_v9, %v645_v51  ;;  %vm718_vm8 = vcmp.lt.s32.totalorder %v2072_v20, 1 }
 0x106   : > { %v562_v8 = vxor.u32 2147483648, %v561_v56  ;;  %v717_v39 = vor.u32 %v716_v52, %v715_v1  ;;  %vm721_vm9 = vcmp.lt.s32.totalorder %v2072_v20, 4  ;;  %v726_v43 = vsel %vm718_vm8, %v705_v35, %v708_v47 }
 0x107   : > { %v648_v10 = vsub.s32 0, %v2097_v30  ;;  %vm720_vm10 = vcmp.lt.s32.totalorder %v2072_v20, 3  ;;  %v727_v48 = vsel %vm721_vm9, %v714_v15, 920167782  ;;  %v734_v7 = vshll.u32 %v694_v59, 8 }
 0x108   : > { %v462_v9 = vsel %vm2086_vm7, %v1855_v26, %v459_v16  ;;  %vm584_vm11 = vcmp.lt.s32.totalorder %v1861_v28, 0  ;;  %v702_v17 = vshrl.u32 %v1662_v58, %v701_v6  ;;  %vm719_vm12 = vcmp.lt.s32.totalorder %v2072_v20, 2 }
 0x109   : > { %v728_v49 = vsel %vm720_vm10, %v711_v50, %v727_v48  ;;  %v563_v57 = vsel %vm480_vm6, %v562_v8, %v561_v56  ;;  %v1373_v42 = vmin.u32 %v648_v10, %v2097_v30  ;;  %v723_v18 = vsel %vm721_vm9, %v711_v50, 2102212464 }
 0x10a   : > { %v729_v53 = vsel %vm719_vm12, %v726_v43, %v728_v49  ;;  %v730_v61 = vsel %vm718_vm8, %v708_v47, %v711_v50  ;;  %v731_v6 = vsel %vm721_vm9, %v717_v39, 1326507024  ;;  %1511 = vcosq.f32 %v462_v9 }
 0x10b   : > { %v2126_v21 = vmul.u32.u64.low %v734_v7, %v729_v53  ;;  %v2127_v25 = vmul.u32.u64.high %v734_v7, %v729_v53, %v2126_v21  ;;  %vm2132_vm13 = vcmp.le.f32.partialorder %v478_v32, 0.7853982  ;;  %vm2138_vm14 = vcmp.le.f32.partialorder %v582_v55, 0.7853982 }
 0x10c   : > { %v650_v33 = vclz %v1373_v42  ;;  %v467_v36 = vadd.s32 3, %v463_v13  ;;  %v722_v37 = vsel %vm718_vm8, %v702_v17, %v705_v35  ;;  %v724_v45 = vsel %vm720_vm10, %v708_v47, %v723_v18 }
 0x10d   : > { %v732_v32 = vsel %vm720_vm10, %v714_v15, %v731_v6  ;;  %v566_v23 = vsel %vm2132_vm13, %v1858_v27, %v563_v57  ;;  %v668_v55 = vsub.s32 4, %v2079_v44  ;;  %1513 = vsinq.f32 %v462_v9 }
 0x10e   : > { %v1374_v52 = vadd.s32 4294967294, %v650_v33  ;;  %v733_v46 = vsel %vm719_vm12, %v730_v61, %v732_v32  ;;  %v565_v35 = vsel %vm480_vm6, %v564_v54, %v1991_v22  ;;  %v638_v59 = vadd.s32 %v2039_v40, %v2036_v38 }
 0x10f   : > { %v2157_v51 = vmul.u32.u64.low %v734_v7, %v733_v46  ;;  %v2158_v47 = vmul.u32.u64.high %v734_v7, %v733_v46, %v2157_v51  ;;  %v725_v15 = vsel %vm719_vm12, %v722_v37, %v724_v45  ;;  %v744_v13 = vadd.s32 1, %v2127_v25 }
 0x110   : > { %vm1375_vm15 = vcmp.lt.s32.totalorder %v1374_v52, 0  ;;  %1515 = vcosq.f32 %v566_v23  ;;  %v790_v50 = vand.u32 2147483647, %v2059_v5  ;;  %v793_v1 = vand.u32 2139095040, %v2059_v5 }
 0x111   : > { %v653_v56 = vsel %vm1375_vm15, 0, %v1374_v52  ;;  %1517 = vsinq.f32 %v566_v23  ;;  %v669_v54 = vsel %vm584_vm11, %v668_v55, %v2079_v44  ;;  %v567_v38 = vsel %vm2132_vm13, 0, %v565_v35 }
 0x112   : > { %v654_v22 = vsub.s32 32, %v653_v56  ;;  %v658_v16 = vsub.s32 4294967266, %v653_v56  ;;  %v741_v40 = vmul.u32 %v734_v7, %v725_v15  ;;  %vm743_vm0 = vc.u32 %v2158_v47, %v2126_v21 }
 0x113   : > { %v794_v20 = vshrl.u32 %v793_v1, 23  ;;  %v655_v8 = vshll.u32 %v2097_v30, %v653_v56  ;;  %v745_v10 = vsel %vm743_vm0, %v744_v13, %v2127_v25  ;;  %v671_v48 = vsel %vm2138_vm14, 0, %v669_v54 }
 0x114   : > { %v656_v39 = vshrl.u32 %v638_v59, %v654_v22  ;;  %v659_v43 = vadd.s32 127, %v658_v16  ;;  %v746_v9 = vadd.s32 %v745_v10, %v741_v40  ;;  %v797_v44 = vand.u32 8388607, %v790_v50  ;;  %v2180_v49 = vpop.eup %1511 }
 0x115   : > { %v1380_v17 = vadd.s32 4294967169, %v794_v20  ;;  %v359_v7 = vmul.f32 %v1845_v19, %v335_v3  ;;  %v2188_v30 = vadd.f32 %v1851_v24, %v2047_v60  ;;  %v2190_v18 = vand.u32 3, %v467_v36 }
 0x116   : > { %v657_v57 = vor.u32 %v656_v39, %v655_v8  ;;  %v660_v42 = vshll.u32 %v659_v43, 23  ;;  %v571_v53 = vadd.s32 3, %v567_v38  ;;  %v747_v61 = vadd.s32 536870912, %v746_v9 }
 0x117   : > { %v800_v6 = vadd.s32 1, %v1380_v17  ;;  %v2193_v25 = vadd.f32 %v1851_v24, %v359_v7  ;;  %v675_v33 = vadd.s32 3, %v671_v48  ;;  %v2195_v37 = vpop.eup %1513  ;;  %v474_v12 = vxor.u32 2147483648, %v2180_v49 }
 0x118   : > { %v661_v63 = vor.u32 4788187, %v660_v42  ;;  %v2198_v14 = vshrl.u32 %v747_v61, 30  ;;  %v798_v19 = vor.u32 8388608, %v797_v44  ;;  %v664_v60 = vcvt.s32.f32 %v657_v57 }
 0x119   : > { %vm801_vm1 = vcmp.gt.s32.totalorder %v800_v6, 0  ;;  %v897_v45 = vand.u32 2139095040, %v2188_v30  ;;  %vm473_vm2 = vcmp.eq.s32.totalorder %v2190_v18, 2  ;;  %v2204_v24 = vand.u32 3, %v571_v53 }
 0x11a   : > { %v662_v3 = vand.u32 2147483647, %v661_v63  ;;  %v802_v36 = vsel %vm801_vm1, %v800_v6, 0  ;;  %v2201_v32 = vpop.eup %1515  ;;  %v749_v23 = vshll.u32 %v2198_v14, 30  ;;  %v894_v52 = vand.u32 2147483647, %v2188_v30 }
 0x11b   : > { %v2208_v55 = vpop.eup %1517  ;;  %v471_v46 = vxor.u32 2147483648, %v2195_v37  ;;  %v2211_v51 = vand.u32 3, %v675_v33  ;;  %v804_v59 = vand.u32 31, %v802_v36  ;;  %v2214_v15 = vsel %vm473_vm2, %v474_v12, %v2195_v37 }
 0x11c   : > { %v665_v35 = vmul.f32 %v664_v60, %v662_v3  ;;  %v742_v13 = vadd.s32 %v2126_v21, %v2158_v47  ;;  %v2218_v56 = vsub.s32 %v746_v9, %v749_v23  ;;  %v2220_v1 = vshll.u32 %v798_v19, 8 }
 0x11d   : > { %v2222_v16 = vshrl.u32 %v802_v36, 5  ;;  %v805_v54 = vsub.s32 32, %v804_v59  ;;  %v898_v38 = vshrl.u32 %v897_v45, 23  ;;  %v575_v40 = vxor.u32 2147483648, %v2208_v55 }
 0x11e   : > { %v666_v22 = vxor.u32 2147483648, %v665_v35  ;;  %v578_v20 = vxor.u32 2147483648, %v2201_v32  ;;  %v752_v8 = vsub.s32 0, %v2218_v56  ;;  %v2229_v39 = vand.u32 8388607, %v894_v52 }
 0x11f   : > { %v772_v47 = vsub.s32 4, %v2198_v14  ;;  %v808_v43 = vshrl.u32 %v1663_v62, %v805_v54  ;;  %v811_v10 = vshrl.u32 %v1664_v0, %v805_v54  ;;  %v807_v9 = vshll.u32 %v1662_v58, %v804_v59 }
 0x120   : > { %v667_v21 = vsel %vm584_vm11, %v666_v22, %v665_v35  ;;  %v1377_v48 = vmin.u32 %v752_v8, %v2218_v56  ;;  %v810_v17 = vshll.u32 %v1663_v62, %v804_v59  ;;  %v814_v44 = vshrl.u32 %v1665_v2, %v805_v54 }
 0x121   : > { %v813_v7 = vshll.u32 %v1664_v0, %v804_v59  ;;  %vm822_vm3 = vcmp.lt.s32.totalorder %v2222_v16, 1  ;;  %vm823_vm4 = vcmp.lt.s32.totalorder %v2222_v16, 2  ;;  %v1384_v57 = vadd.s32 4294967169, %v898_v38 }
 0x122   : > { %v670_v42 = vsel %vm2138_vm14, %v1861_v28, %v667_v21  ;;  %vm688_vm5 = vcmp.lt.s32.totalorder %v1949_v41, 0  ;;  %v754_v53 = vclz %v1377_v48  ;;  %v809_v61 = vor.u32 %v808_v43, %v807_v9 }
 0x123   : > { %v812_v6 = vor.u32 %v811_v10, %v810_v17  ;;  %v806_v63 = vshrl.u32 %v1662_v58, %v805_v54  ;;  %v815_v33 = vor.u32 %v814_v44, %v813_v7  ;;  %v816_v12 = vshll.u32 %v1665_v2, %v804_v59 }
 0x124   : > { %v817_v19 = vshrl.u32 %v1666_v4, %v805_v54  ;;  %vm470_vm6 = vcmp.eq.s32.totalorder %v2190_v18, 0  ;;  %vm577_vm7 = vcmp.eq.s32.totalorder %v2204_v24, 2  ;;  %v1378_v3 = vadd.s32 4294967294, %v754_v53 }
 0x125   : > { %v819_v31 = vshll.u32 %v1666_v4, %v804_v59  ;;  %v820_v60 = vshrl.u32 %v1667_v11, %v805_v54  ;;  %vm825_vm8 = vcmp.lt.s32.totalorder %v2222_v16, 4  ;;  %vm574_vm9 = vcmp.eq.s32.totalorder %v2204_v24, 0 }
 0x126   : > { %1519 = vcosq.f32 %v670_v42  ;;  %v818_v36 = vor.u32 %v817_v19, %v816_v12  ;;  %vm824_vm10 = vcmp.lt.s32.totalorder %v2222_v16, 3  ;;  %v827_v45 = vsel %vm825_vm8, %v815_v33, 2102212464 }
 0x127   : > { %vm2261_vm11 = vcmp.le.f32.partialorder %v686_v34, 0.7853982  ;;  %vm1379_vm12 = vcmp.lt.s32.totalorder %v1378_v3, 0  ;;  %v821_v35 = vor.u32 %v820_v60, %v819_v31  ;;  %v826_v59 = vsel %vm822_vm3, %v806_v63, %v809_v61 }
 0x128   : > { %v830_v22 = vsel %vm822_vm3, %v809_v61, %v812_v6  ;;  %v757_v54 = vsel %vm1379_vm12, 0, %v1378_v3  ;;  %v828_v38 = vsel %vm824_vm10, %v812_v6, %v827_v45  ;;  %v831_v8 = vsel %vm825_vm8, %v818_v36, 920167782 }
 0x129   : > { %v904_v21 = vadd.s32 1, %v1384_v57  ;;  %v758_v34 = vsub.s32 32, %v757_v54  ;;  %v762_v43 = vsub.s32 4294967266, %v757_v54  ;;  %v832_v10 = vsel %vm824_vm10, %v815_v33, %v831_v8 }
 0x12a   : > { %v834_v48 = vsel %vm822_vm3, %v812_v6, %v815_v33  ;;  %v759_v9 = vshll.u32 %v2218_v56, %v757_v54  ;;  %v833_v17 = vsel %vm823_vm4, %v830_v22, %v832_v10  ;;  %v835_v44 = vsel %vm825_vm8, %v821_v35, 1326507024 }
 0x12b   : > { %vm905_vm13 = vcmp.gt.s32.totalorder %v904_v21, 0  ;;  %v760_v7 = vshrl.u32 %v742_v13, %v758_v34  ;;  %v763_v53 = vadd.s32 127, %v762_v43  ;;  %v836_v57 = vsel %vm824_vm10, %v818_v36, %v835_v44 }
 0x12c   : > { %v906_v61 = vsel %vm905_vm13, %v904_v21, 0  ;;  %v773_v63 = vsel %vm688_vm5, %v772_v47, %v2198_v14  ;;  %v837_v56 = vsel %vm823_vm4, %v834_v48, %v836_v57  ;;  %v829_v13 = vsel %vm823_vm4, %v826_v59, %v828_v38 }
 0x12d   : > { %v2290_v6 = vmul.u32.u64.low %v2220_v1, %v833_v17  ;;  %v2291_v33 = vmul.u32.u64.high %v2220_v1, %v833_v17, %v2290_v6  ;;  %v761_v12 = vor.u32 %v760_v7, %v759_v9  ;;  %v764_v19 = vshll.u32 %v763_v53, 23 }
 0x12e   : > { %v908_v3 = vand.u32 31, %v906_v61  ;;  %v2301_v14 = vsel %vm470_vm6, %v2180_v49, %v471_v46  ;;  %v2308_v47 = vsel %vm577_vm7, %v578_v20, %v2208_v55  ;;  %v2319_v37 = vsel %vm574_vm9, %v2201_v32, %v575_v40 }
 0x12f   : > { %v2311_v31 = vmul.u32.u64.low %v2220_v1, %v837_v56  ;;  %v2312_v60 = vmul.u32.u64.high %v2220_v1, %v837_v56, %v2311_v31  ;;  %v765_v49 = vor.u32 4788187, %v764_v19  ;;  %v902_v46 = vor.u32 8388608, %v2229_v39 }
 0x130   : > { %v909_v16 = vsub.s32 32, %v908_v3  ;;  %v2322_v36 = vpop.eup %1519  ;;  %1521 = vsinq.f32 %v670_v42  ;;  %v775_v20 = vsel %vm2261_vm11, 0, %v773_v63  ;;  %v845_v45 = vmul.u32 %v2220_v1, %v829_v13 }
 0x131   : > { %v848_v35 = vadd.s32 1, %v2291_v33  ;;  %v766_v55 = vand.u32 2147483647, %v765_v49  ;;  %v768_v59 = vcvt.s32.f32 %v761_v12  ;;  %v911_v22 = vshll.u32 %v1662_v58, %v908_v3 }
 0x132   : > { %v912_v32 = vshrl.u32 %v1663_v62, %v909_v16  ;;  %vm847_vm14 = vc.u32 %v2312_v60, %v2290_v6  ;;  %v2332_v40 = vshrl.u32 %v906_v61, 5  ;;  %v914_v39 = vshll.u32 %v1663_v62, %v908_v3 }
 0x133   : > { %v915_v42 = vshrl.u32 %v1664_v0, %v909_v16  ;;  %v769_v54 = vmul.f32 %v768_v59, %v766_v55  ;;  %v849_v1 = vsel %vm847_vm14, %v848_v35, %v2291_v33  ;;  %v917_v8 = vshll.u32 %v1664_v0, %v908_v3 }
 0x134   : > { %v913_v38 = vor.u32 %v912_v32, %v911_v22  ;;  %v850_v21 = vadd.s32 %v849_v1, %v845_v45  ;;  %v918_v43 = vshrl.u32 %v1665_v2, %v909_v16  ;;  %v920_v10 = vshll.u32 %v1665_v2, %v908_v3 }
 0x135   : > { %v916_v34 = vor.u32 %v915_v42, %v914_v39  ;;  %v770_v48 = vxor.u32 2147483648, %v769_v54  ;;  %v921_v9 = vshrl.u32 %v1666_v4, %v909_v16  ;;  %v923_v17 = vshll.u32 %v1666_v4, %v908_v3 }
 0x136   : > { %v924_v44 = vshrl.u32 %v1667_v11, %v909_v16  ;;  %vm469_vm15 = vcmp.lt.s32.totalorder %v2190_v18, 2  ;;  %v682_v7 = vxor.u32 2147483648, %v2322_v36  ;;  %v779_v53 = vadd.s32 3, %v775_v20 }
 0x137   : > { %v851_v57 = vadd.s32 536870912, %v850_v21  ;;  %v919_v61 = vor.u32 %v918_v43, %v917_v8  ;;  %v771_v63 = vsel %vm688_vm5, %v770_v48, %v769_v54  ;;  %v922_v56 = vor.u32 %v921_v9, %v920_v10 }
 0x138   : > { %v925_v33 = vor.u32 %v924_v44, %v923_v17  ;;  %vm926_vm0 = vcmp.lt.s32.totalorder %v2332_v40, 1  ;;  %vm573_vm1 = vcmp.lt.s32.totalorder %v2204_v24, 2  ;;  %v774_v12 = vsel %vm2261_vm11, %v1949_v41, %v771_v63 }
 0x139   : > { %v852_v19 = vshrl.u32 %v851_v57, 30  ;;  %v910_v13 = vshrl.u32 %v1662_v58, %v909_v16  ;;  %vm929_vm2 = vcmp.lt.s32.totalorder %v2332_v40, 4  ;;  %vm466_vm3 = vweird.f32 %v1855_v26 }
 0x13a   : > { %vm927_vm4 = vcmp.lt.s32.totalorder %v2332_v40, 2  ;;  %vm928_vm5 = vcmp.lt.s32.totalorder %v2332_v40, 3  ;;  %v934_v3 = vsel %vm926_vm0, %v913_v38, %v916_v34  ;;  %v935_v31 = vsel %vm929_vm2, %v922_v56, 920167782  ;;  %v1522_v49 = vpop.eup %1521 }
 0x13b   : > { %vm678_vm6 = vcmp.eq.s32.totalorder %v2211_v51, 0  ;;  %1523 = vcosq.f32 %v774_v12  ;;  %v853_v23 = vshll.u32 %v852_v19, 30  ;;  %v930_v16 = vsel %vm926_vm0, %v910_v13, %v913_v38 }
 0x13c   : > { %v931_v20 = vsel %vm929_vm2, %v919_v61, 2102212464  ;;  %vm570_vm7 = vweird.f32 %v1858_v27  ;;  %v936_v45 = vsel %vm928_vm5, %v919_v61, %v935_v31  ;;  %v938_v35 = vsel %vm926_vm0, %v916_v34, %v919_v61 }
 0x13d   : > { %v939_v55 = vsel %vm929_vm2, %v925_v33, 1326507024  ;;  %v942_v59 = vshll.u32 %v902_v46, 8  ;;  %1525 = vsinq.f32 %v774_v12  ;;  %v2367_v22 = vsub.s32 %v850_v21, %v853_v23 }
 0x13e   : > { %v937_v32 = vsel %vm927_vm4, %v934_v3, %v936_v45  ;;  %v940_v39 = vsel %vm928_vm5, %v922_v56, %v939_v55  ;;  %vm677_vm8 = vcmp.lt.s32.totalorder %v2211_v51, 2  ;;  %v932_v42 = vsel %vm928_vm5, %v916_v34, %v931_v20 }
 0x13f   : > { %v941_v54 = vsel %vm927_vm4, %v938_v35, %v940_v39  ;;  %v2378_v1 = vmul.u32.u64.low %v942_v59, %v937_v32  ;;  %v2379_v38 = vmul.u32.u64.high %v942_v59, %v937_v32, %v2378_v1  ;;  %v856_v46 = vsub.s32 0, %v2367_v22 }
 0x140   : > { %v876_v8 = vsub.s32 4, %v852_v19  ;;  %v2383_v21 = vmul.u32.u64.low %v942_v59, %v941_v54  ;;  %v2384_v43 = vmul.u32.u64.high %v942_v59, %v941_v54, %v2383_v21  ;;  %v476_v10 = vsel %vm469_vm15, %v2301_v14, %v2214_v15 }
 0x141   : > { %v679_v48 = vxor.u32 2147483648, %v1522_v49  ;;  %vm681_vm9 = vcmp.eq.s32.totalorder %v2211_v51, 2  ;;  %vm2393_vm10 = vcmp.le.f32.partialorder %v790_v50, 0.7853982  ;;  %v1381_v9 = vmin.u32 %v856_v46, %v2367_v22 }
 0x142   : > { %v933_v17 = vsel %vm927_vm4, %v930_v16, %v932_v42  ;;  %v998_v44 = vand.u32 2147483647, %v2193_v25  ;;  %v1001_v57 = vand.u32 2139095040, %v2193_v25  ;;  %v580_v18 = vsel %vm573_vm1, %v2319_v37, %v2308_v47 }
 0x143   : > { %v2406_v15 = vand.u32 3, %v779_v53  ;;  %vm792_vm11 = vcmp.lt.s32.totalorder %v2059_v5, 0  ;;  %v952_v50 = vadd.s32 1, %v2379_v38  ;;  %v2412_v14 = vsel %vm466_vm3, nan, %v476_v10 }
 0x144   : > { %vm674_vm12 = vweird.f32 %v1861_v28  ;;  %v683_v40 = vsel %vm681_vm9, %v682_v7, %v1522_v49  ;;  %v858_v61 = vclz %v1381_v9  ;;  %v877_v63 = vsel %vm792_vm11, %v876_v8, %v852_v19 }
 0x145   : > { %v680_v24 = vsel %vm678_vm6, %v2322_v36, %v679_v48  ;;  %v949_v47 = vmul.u32 %v942_v59, %v933_v17  ;;  %vm951_vm13 = vc.u32 %v2384_v43, %v2378_v1  ;;  %v1002_v37 = vshrl.u32 %v1001_v57, 23  ;;  %v1524_v53 = vpop.eup %1523 }
 0x146   : > { %v2424_v26 = vsel %vm570_vm7, nan, %v580_v18  ;;  %v1382_v56 = vadd.s32 4294967294, %v858_v61  ;;  %v953_v7 = vsel %vm951_vm13, %v952_v50, %v2379_v38  ;;  %v1005_v33 = vand.u32 8388607, %v998_v44 }
 0x147   : > { %vm782_vm14 = vcmp.eq.s32.totalorder %v2406_v15, 0  ;;  %v879_v36 = vsel %vm2393_vm10, 0, %v877_v63  ;;  %v954_v12 = vadd.s32 %v953_v7, %v949_v47  ;;  %v1388_v19 = vadd.s32 4294967169, %v1002_v37  ;;  %v1526_v13 = vpop.eup %1525 }
 0x148   : > { %v684_v3 = vsel %vm677_vm8, %v680_v24, %v683_v40  ;;  %vm785_vm15 = vcmp.eq.s32.totalorder %v2406_v15, 2  ;;  %v846_v27 = vadd.s32 %v2290_v6, %v2312_v60  ;;  %vm1383_vm0 = vcmp.lt.s32.totalorder %v1382_v56, 0 }
 0x149   : > { %v861_v31 = vsel %vm1383_vm0, 0, %v1382_v56  ;;  %v955_v49 = vadd.s32 536870912, %v954_v12  ;;  %v1008_v23 = vadd.s32 1, %v1388_v19  ;;  %v1105_v16 = vand.u32 2139095040, %v1864_v29 }
 0x14a   : > { %v862_v20 = vsub.s32 32, %v861_v31  ;;  %v866_v45 = vsub.s32 4294967266, %v861_v31  ;;  %v883_v35 = vadd.s32 3, %v879_v36  ;;  %v1006_v55 = vor.u32 8388608, %v1005_v33 }
 0x14b   : > { %v783_v59 = vxor.u32 2147483648, %v1526_v13  ;;  %v786_v32 = vxor.u32 2147483648, %v1524_v53  ;;  %vm896_vm1 = vcmp.lt.s32.totalorder %v2188_v30, 0  ;;  %v956_v51 = vshrl.u32 %v955_v49, 30 }
 0x14c   : > { %vm1009_vm2 = vcmp.gt.s32.totalorder %v1008_v23, 0  ;;  %v863_v39 = vshll.u32 %v2367_v22, %v861_v31  ;;  %v864_v42 = vshrl.u32 %v846_v27, %v862_v20  ;;  %v867_v6 = vadd.s32 127, %v866_v45 }
 0x14d   : > { %v1010_v60 = vsel %vm1009_vm2, %v1008_v23, 0  ;;  %v2442_v54 = vsel %vm674_vm12, nan, %v684_v3  ;;  %v957_v38 = vshll.u32 %v956_v51, 30  ;;  %v1106_v8 = vshrl.u32 %v1105_v16, 23 }
 0x14e   : > { %v1012_v46 = vand.u32 31, %v1010_v60  ;;  %v865_v21 = vor.u32 %v864_v42, %v863_v39  ;;  %v868_v10 = vshll.u32 %v867_v6, 23  ;;  %v2444_v48 = vand.u32 3, %v883_v35 }
 0x14f   : > { %v950_v9 = vadd.s32 %v2378_v1, %v2384_v43  ;;  %v2448_v17 = vsub.s32 %v954_v12, %v957_v38  ;;  %v2450_v57 = vshll.u32 %v1006_v55, 8  ;;  %v1102_v18 = vand.u32 2147483647, %v1864_v29 }
 0x150   : > { %v1013_v22 = vsub.s32 32, %v1012_v46  ;;  %v2455_v28 = vsel %vm782_vm14, %v1524_v53, %v783_v59  ;;  %v2459_v50 = vsel %vm785_vm15, %v786_v32, %v1526_v13  ;;  %v869_v40 = vor.u32 4788187, %v868_v10 }
 0x151   : > { %v980_v61 = vsub.s32 4, %v956_v51  ;;  %v960_v63 = vsub.s32 0, %v2448_v17  ;;  %v1011_v1 = vshrl.u32 %v1010_v60, 5  ;;  %v2463_v24 = vadd.s32 4294967169, %v1106_v8 }
 0x152   : > { %v1016_v43 = vshrl.u32 %v1663_v62, %v1013_v22  ;;  %v870_v47 = vand.u32 2147483647, %v869_v40  ;;  %v872_v37 = vcvt.s32.f32 %v865_v21  ;;  %v1019_v56 = vshrl.u32 %v1664_v0, %v1013_v22 }
 0x153   : > { %v1022_v53 = vshrl.u32 %v1665_v2, %v1013_v22  ;;  %v1385_v7 = vmin.u32 %v960_v63, %v2448_v17  ;;  %v1015_v33 = vshll.u32 %v1662_v58, %v1012_v46  ;;  %v1018_v36 = vshll.u32 %v1663_v62, %v1012_v46 }
 0x154   : > { %v1021_v12 = vshll.u32 %v1664_v0, %v1012_v46  ;;  %v873_v19 = vmul.f32 %v872_v37, %v870_v47  ;;  %v2473_v13 = vsel %vm896_vm1, %v980_v61, %v956_v51  ;;  %v1024_v3 = vshll.u32 %v1665_v2, %v1012_v46 }
 0x155   : > { %v1025_v27 = vshrl.u32 %v1666_v4, %v1013_v22  ;;  %v962_v31 = vclz %v1385_v7  ;;  %v1017_v49 = vor.u32 %v1016_v43, %v1015_v33  ;;  %v1020_v23 = vor.u32 %v1019_v56, %v1018_v36  ;;  %v273_v43 = vld [vmem:[%s1814_s26] sm:$0xff]  ;;  %v274_v7 = vld [vmem:[%s1814_s26 + $0x8] sm:$0xff]  ;;  %v275_v33 = vld [vmem:[%s1814_s26 + $0x10] sm:$0xff] }
 0x156   : > { %v1023_v16 = vor.u32 %v1022_v53, %v1021_v12  ;;  %v874_v20 = vxor.u32 2147483648, %v873_v19  ;;  %v1027_v35 = vshll.u32 %v1666_v4, %v1012_v46  ;;  %v1028_v55 = vshrl.u32 %v1667_v11, %v1013_v22 }
 0x157   : > { %v1026_v45 = vor.u32 %v1025_v27, %v1024_v3  ;;  %vm781_vm3 = vcmp.lt.s32.totalorder %v2406_v15, 2  ;;  %v1386_v59 = vadd.s32 4294967294, %v962_v31  ;;  %v1014_v32 = vshrl.u32 %v1662_v58, %v1013_v22 }
 0x158   : > { %vm1030_vm4 = vcmp.lt.s32.totalorder %v1011_v1, 1  ;;  %vm1031_vm5 = vcmp.lt.s32.totalorder %v1011_v1, 2  ;;  %v875_v51 = vsel %vm792_vm11, %v874_v20, %v873_v19  ;;  %vm2485_vm6 = vcmp.le.f32.partialorder %v894_v52, 0.7853982 }
 0x159   : > { %v1029_v42 = vor.u32 %v1028_v55, %v1027_v35  ;;  %vm1032_vm7 = vcmp.lt.s32.totalorder %v1011_v1, 3  ;;  %vm1033_vm8 = vcmp.lt.s32.totalorder %v1011_v1, 4  ;;  %v878_v6 = vsel %vm2393_vm10, %v2059_v5, %v875_v51 }
 0x15a   : > { %vm1387_vm9 = vcmp.lt.s32.totalorder %v1386_v59, 0  ;;  %v1034_v60 = vsel %vm1030_vm4, %v1014_v32, %v1017_v49  ;;  %v1035_v38 = vsel %vm1033_vm8, %v1023_v16, 2102212464  ;;  %1527 = vcosq.f32 %v878_v6 }
 0x15b   : > { %v965_v46 = vsel %vm1387_vm9, 0, %v1386_v59  ;;  %v1038_v52 = vsel %vm1030_vm4, %v1017_v49, %v1020_v23  ;;  %v1039_v8 = vsel %vm1033_vm8, %v1026_v45, 920167782  ;;  %1529 = vsinq.f32 %v878_v6 }
 0x15c   : > { %v966_v21 = vsub.s32 32, %v965_v46  ;;  %v970_v10 = vsub.s32 4294967266, %v965_v46  ;;  %v1036_v34 = vsel %vm1032_vm7, %v1020_v23, %v1035_v38  ;;  %v967_v22 = vshll.u32 %v2448_v17, %v965_v46 }
 0x15d   : > { %v1040_v40 = vsel %vm1032_vm7, %v1023_v16, %v1039_v8  ;;  %v1042_v61 = vsel %vm1030_vm4, %v1020_v23, %v1023_v16  ;;  %v1043_v63 = vsel %vm1033_vm8, %v1029_v42, 1326507024  ;;  %vm778_vm10 = vweird.f32 %v1949_v41 }
 0x15e   : > { %v968_v47 = vshrl.u32 %v950_v9, %v966_v21  ;;  %v971_v37 = vadd.s32 127, %v970_v10  ;;  %v1041_v56 = vsel %vm1031_vm5, %v1038_v52, %v1040_v40  ;;  %v1044_v53 = vsel %vm1032_vm7, %v1026_v45, %v1043_v63 }
 0x15f   : > { %v1037_v36 = vsel %vm1031_vm5, %v1034_v60, %v1036_v34  ;;  %v1045_v17 = vsel %vm1031_vm5, %v1042_v61, %v1044_v53  ;;  %v2510_v12 = vmul.u32.u64.low %v2450_v57, %v1041_v56  ;;  %v2511_v19 = vmul.u32.u64.high %v2450_v57, %v1041_v56, %v2510_v12 }
 0x160   : > { %v969_v3 = vor.u32 %v968_v47, %v967_v22  ;;  %v972_v27 = vshll.u32 %v971_v37, 23  ;;  %v2515_v9 = vmul.u32.u64.low %v2450_v57, %v1045_v17  ;;  %v2516_v31 = vmul.u32.u64.high %v2450_v57, %v1045_v17, %v2515_v9 }
 0x161   : > { %v788_v49 = vsel %vm781_vm3, %v2455_v28, %v2459_v50  ;;  %v2524_v1 = vand.u32 8388607, %v1102_v18  ;;  %v1112_v23 = vadd.s32 1, %v2463_v24  ;;  %v1206_v16 = vadd.f32 %v2412_v14, %v273_v43 }
 0x162   : > { %v973_v20 = vor.u32 4788187, %v972_v27  ;;  %v983_v45 = vsel %vm2485_vm6, 0, %v2473_v13  ;;  %v1207_v35 = vadd.f32 %v2424_v26, %v274_v7  ;;  %v1208_v55 = vadd.f32 %v2442_v54, %v275_v33 }
 0x163   : > { %v1053_v15 = vmul.u32 %v2450_v57, %v1037_v36  ;;  %v1056_v28 = vadd.s32 1, %v2511_v19  ;;  %vm1113_vm11 = vcmp.gt.s32.totalorder %v1112_v23, 0  ;;  %v1214_v50 = vmul.f32 %v1206_v16, %v2412_v14  ;;  %v276_v36 = vld [vmem:[%s1814_s26 + $0x18] sm:$0xff] }
 0x164   : > { %v974_v24 = vand.u32 2147483647, %v973_v20  ;;  %v976_v59 = vcvt.s32.f32 %v969_v3  ;;  %vm1055_vm12 = vc.u32 %v2516_v31, %v2510_v12  ;;  %v1114_v32 = vsel %vm1113_vm11, %v1112_v23, 0  ;;  %v1528_v51 = vpop.eup %1527 }
 0x165   : > { %v987_v13 = vadd.s32 3, %v983_v45  ;;  %v1057_v42 = vsel %vm1055_vm12, %v1056_v28, %v2511_v19  ;;  %v1116_v6 = vand.u32 31, %v1114_v32  ;;  %v1215_v60 = vmul.f32 %v1207_v35, %v2424_v26  ;;  %1222 = vst [vmem:[%s2542_s9] sm:$0xff] %v1214_v50  ;;  %v1530_v14 = vpop.eup %1529  ;;  %v277_v50 = vld [vmem:[%s1814_s26 + $0x20] sm:$0xff] }
 0x166   : > { %vm885_vm13 = vcmp.lt.s32.totalorder %v2444_v48, 2  ;;  %vm886_vm14 = vcmp.eq.s32.totalorder %v2444_v48, 0  ;;  %v977_v57 = vmul.f32 %v976_v59, %v974_v24  ;;  %v1058_v38 = vadd.s32 %v1057_v42, %v1053_v15 }
 0x167   : > { %v1216_v46 = vmul.f32 %v1208_v55, %v2442_v54  ;;  %v2550_v52 = vsel %vm778_vm10, nan, %v788_v49  ;;  %vm889_vm15 = vcmp.eq.s32.totalorder %v2444_v48, 2  ;;  %v890_v26 = vxor.u32 2147483648, %v1528_v51  ;;  %1223 = vst [vmem:[%s2542_s9 + $0x8] sm:$0xff] %v1215_v60 }
 0x168   : > { %v1117_v8 = vsub.s32 32, %v1116_v6  ;;  %v887_v21 = vxor.u32 2147483648, %v1530_v14  ;;  %v978_v10 = vxor.u32 2147483648, %v977_v57  ;;  %v1059_v34 = vadd.s32 536870912, %v1058_v38 }
 0x169   : > { %v1110_v22 = vor.u32 8388608, %v2524_v1  ;;  %1224 = vst [vmem:[%s2542_s9 + $0x10] sm:$0xff] %v1216_v46  ;;  %v2556_v40 = vand.u32 3, %v987_v13  ;;  %v2558_v61 = vshrl.u32 %v1114_v32, 5  ;;  %vm882_vm0 = vweird.f32 %v2059_v5 }
 0x16a   : > { %v1120_v41 = vshrl.u32 %v1663_v62, %v1117_v8  ;;  %v1123_v54 = vshrl.u32 %v1664_v0, %v1117_v8  ;;  %v979_v63 = vsel %vm896_vm1, %v978_v10, %v977_v57  ;;  %v2565_v43 = vshrl.u32 %v1059_v34, 30 }
 0x16b   : > { %v1119_v47 = vshll.u32 %v1662_v58, %v1116_v6  ;;  %v1126_v37 = vshrl.u32 %v1665_v2, %v1117_v8  ;;  %v891_v56 = vsel %vm889_vm15, %v890_v26, %v1530_v14  ;;  %v982_v53 = vsel %vm2485_vm6, %v2188_v30, %v979_v63 }
 0x16c   : > { %v1122_v7 = vshll.u32 %v1663_v62, %v1116_v6  ;;  %v1125_v33 = vshll.u32 %v1664_v0, %v1116_v6  ;;  %v888_v17 = vsel %vm886_vm14, %v1528_v51, %v887_v21  ;;  %1531 = vcosq.f32 %v982_v53 }
 0x16d   : > { %v1061_v19 = vshll.u32 %v2565_v43, 30  ;;  %v1121_v3 = vor.u32 %v1120_v41, %v1119_v47  ;;  %1533 = vsinq.f32 %v982_v53  ;;  %v1128_v9 = vshll.u32 %v1665_v2, %v1116_v6 }
 0x16e   : > { %v1124_v27 = vor.u32 %v1123_v54, %v1122_v7  ;;  %v1129_v49 = vshrl.u32 %v1666_v4, %v1117_v8  ;;  %v1127_v1 = vor.u32 %v1126_v37, %v1125_v33  ;;  %v1131_v62 = vshll.u32 %v1666_v4, %v1116_v6  ;;  %v278_v37 = vld [vmem:[%s1814_s26 + $0x28] sm:$0xff] }
 0x16f   : > { %v2582_v39 = vsub.s32 %v1058_v38, %v1061_v19  ;;  %v1132_v0 = vshrl.u32 %v1667_v11, %v1117_v8  ;;  %v892_v23 = vsel %vm885_vm13, %v888_v17, %v891_v56  ;;  %v1150_v20 = vshll.u32 %v1110_v22, 8 }
 0x170   : > { %v1130_v16 = vor.u32 %v1129_v49, %v1128_v9  ;;  %v1209_v45 = vadd.f32 %v2550_v52, %v276_v36  ;;  %vm1134_vm1 = vcmp.lt.s32.totalorder %v2558_v61, 1  ;;  %vm1137_vm2 = vcmp.lt.s32.totalorder %v2558_v61, 4 }
 0x171   : > { %v1064_v35 = vsub.s32 0, %v2582_v39  ;;  %v1133_v2 = vor.u32 %v1132_v0, %v1131_v62  ;;  %v1118_v55 = vshrl.u32 %v1662_v58, %v1117_v8  ;;  %vm1136_vm3 = vcmp.lt.s32.totalorder %v2558_v61, 3 }
 0x172   : > { %v1142_v4 = vsel %vm1134_vm1, %v1121_v3, %v1124_v27  ;;  %v1143_v11 = vsel %vm1137_vm2, %v1130_v16, 920167782  ;;  %vm1135_vm4 = vcmp.lt.s32.totalorder %v2558_v61, 2  ;;  %v1139_v15 = vsel %vm1137_vm2, %v1127_v1, 2102212464 }
 0x173   : > { %v1389_v48 = vmin.u32 %v1064_v35, %v2582_v39  ;;  %v1144_v28 = vsel %vm1136_vm3, %v1127_v1, %v1143_v11  ;;  %v893_v24 = vsel %vm882_vm0, nan, %v892_v23  ;;  %v1146_v59 = vsel %vm1134_vm1, %v1124_v27, %v1127_v1 }
 0x174   : > { %v1145_v58 = vsel %vm1135_vm4, %v1142_v4, %v1144_v28  ;;  %v1147_v32 = vsel %vm1137_vm2, %v1133_v2, 1326507024  ;;  %vm986_vm5 = vweird.f32 %v2188_v30  ;;  %vm989_vm6 = vcmp.lt.s32.totalorder %v2556_v40, 2 }
 0x175   : > { %v1066_v51 = vclz %v1389_v48  ;;  %v1138_v13 = vsel %vm1134_vm1, %v1118_v55, %v1121_v3  ;;  %v1140_v42 = vsel %vm1136_vm3, %v1124_v27, %v1139_v15  ;;  %v1148_v5 = vsel %vm1136_vm3, %v1130_v16, %v1147_v32 }
 0x176   : > { %v2615_v6 = vmul.u32.u64.low %v1150_v20, %v1145_v58  ;;  %v2616_v60 = vmul.u32.u64.high %v1150_v20, %v1145_v58, %v2615_v6  ;;  %v1532_v14 = vpop.eup %1531  ;;  %v1149_v38 = vsel %vm1135_vm4, %v1146_v59, %v1148_v5  ;;  %v1210_v46 = vadd.f32 %v893_v24, %v277_v50 }
 0x177   : > { %v1390_v57 = vadd.s32 4294967294, %v1066_v51  ;;  %v1217_v26 = vmul.f32 %v1209_v45, %v2550_v52  ;;  %v1534_v8 = vpop.eup %1533  ;;  %vm993_vm7 = vcmp.eq.s32.totalorder %v2556_v40, 2  ;;  %v994_v21 = vxor.u32 2147483648, %v1532_v14 }
 0x178   : > { %v2623_v10 = vmul.u32.u64.low %v1150_v20, %v1149_v38  ;;  %v2624_v34 = vmul.u32.u64.high %v1150_v20, %v1149_v38, %v2623_v10  ;;  %v991_v22 = vxor.u32 2147483648, %v1534_v8  ;;  %v1141_v41 = vsel %vm1135_vm4, %v1138_v13, %v1140_v42 }
 0x179   : > { %vm1391_vm8 = vcmp.lt.s32.totalorder %v1390_v57, 0  ;;  %v1218_v54 = vmul.f32 %v1210_v46, %v893_v24  ;;  %1225 = vst [vmem:[%s2542_s9 + $0x18] sm:$0xff] %v1217_v26  ;;  %vm990_vm9 = vcmp.eq.s32.totalorder %v2556_v40, 0  ;;  %v995_v63 = vsel %vm993_vm7, %v994_v21, %v1534_v8  ;;  %v279_v10 = vld [vmem:[%s1814_s26 + $0x30] sm:$0xff] }
 0x17a   : > { %v1069_v47 = vsel %vm1391_vm8, 0, %v1390_v57  ;;  %v1160_v52 = vadd.s32 1, %v2616_v60  ;;  %v992_v56 = vsel %vm990_vm9, %v1532_v14, %v991_v22  ;;  %v1054_v53 = vadd.s32 %v2510_v12, %v2516_v31 }
 0x17b   : > { %v1070_v7 = vsub.s32 32, %v1069_v47  ;;  %v1074_v33 = vsub.s32 4294967266, %v1069_v47  ;;  %1226 = vst [vmem:[%s2542_s9 + $0x20] sm:$0xff] %v1218_v54  ;;  %v996_v61 = vsel %vm989_vm6, %v992_v56, %v995_v63  ;;  %v1071_v36 = vshll.u32 %v2582_v39, %v1069_v47 }
 0x17c   : > { %v1157_v17 = vmul.u32 %v1150_v20, %v1141_v41  ;;  %vm1159_vm10 = vc.u32 %v2624_v34, %v2615_v6  ;;  %v997_v19 = vsel %vm986_vm5, nan, %v996_v61  ;;  %v1084_v30 = vsub.s32 4, %v2565_v43 }
 0x17d   : > { %v1072_v3 = vshrl.u32 %v1054_v53, %v1070_v7  ;;  %v1075_v27 = vadd.s32 127, %v1074_v33  ;;  %v1161_v12 = vsel %vm1159_vm10, %v1160_v52, %v2616_v60  ;;  %v1211_v9 = vadd.f32 %v997_v19, %v278_v37 }
 0x17e   : > { %v1162_v31 = vadd.s32 %v1161_v12, %v1157_v17  ;;  %vm1000_vm11 = vcmp.lt.s32.totalorder %v2193_v25, 0  ;;  %vm999_vm12 = vcmp.le.f32.partialorder %v998_v44, 0.7853982  ;;  %v1158_v32 = vadd.s32 %v2615_v6, %v2624_v34  ;;  %v280_v12 = vld [vmem:[%s1814_s26 + $0x38] sm:$0xff]  ;;  %s1231_s26 = scalar_lea.sflag [#allocation4], %s1808_s22 }
 0x17f   : > { %v1073_v49 = vor.u32 %v1072_v3, %v1071_v36  ;;  %v1076_v1 = vshll.u32 %v1075_v27, 23  ;;  %v1219_v62 = vmul.f32 %v1211_v9, %v997_v19  ;;  %v1085_v11 = vsel %vm1000_vm11, %v1084_v30, %v2565_v43 }
 0x180   : > { %v1163_v40 = vadd.s32 536870912, %v1162_v31  ;;  %v1087_v28 = vsel %vm999_vm12, 0, %v1085_v11  ;;  %vm1090_vm1 = vweird.f32 %v2193_v25  ;;  %vm1104_vm2 = vcmp.lt.s32.totalorder %v1864_v29, 0 }
 0x181   : > { %v1077_v0 = vor.u32 4788187, %v1076_v1  ;;  %1227 = vst [vmem:[%s2542_s9 + $0x28] sm:$0xff] %v1219_v62  ;;  %v1080_v16 = vcvt.s32.f32 %v1073_v49  ;;  %v1091_v58 = vadd.s32 3, %v1087_v28  ;;  %vm1103_vm3 = vcmp.le.f32.partialorder %v1102_v18, 0.7853982 }
 0x182   : > { %v1164_v23 = vshrl.u32 %v1163_v40, 30  ;;  %vm1194_vm7 = vweird.f32 %v1864_v29 }
 0x183   : > { %v1078_v39 = vand.u32 2147483647, %v1077_v0  ;;  %v1092_v13 = vand.u32 3, %v1091_v58 }
 0x184   : > { %v1165_v20 = vshll.u32 %v1164_v23, 30  ;;  %v1188_v47 = vsub.s32 4, %v1164_v23 }
 0x185   : > { %v1081_v45 = vmul.f32 %v1080_v16, %v1078_v39  ;;  %vm1097_vm14 = vcmp.eq.s32.totalorder %v1092_v13, 2  ;;  %vm1094_vm15 = vcmp.eq.s32.totalorder %v1092_v13, 0  ;;  %vm1093_vm0 = vcmp.lt.s32.totalorder %v1092_v13, 2 }
 0x186   : > { %v1166_v35 = vsub.s32 %v1162_v31, %v1165_v20  ;;  %v1189_v7 = vsel %vm1104_vm2, %v1188_v47, %v1164_v23 }
 0x187   : > { %v1082_v2 = vxor.u32 2147483648, %v1081_v45  ;;  %v1191_v33 = vsel %vm1103_vm3, 0, %v1189_v7 }
 0x188   : > { %v1168_v55 = vsub.s32 0, %v1166_v35  ;;  %v1195_v61 = vadd.s32 3, %v1191_v33 }
 0x189   : > { %v1083_v4 = vsel %vm1000_vm11, %v1082_v2, %v1081_v45 }
 0x18a   : > { %v1086_v48 = vsel %vm999_vm12, %v2193_v25, %v1083_v4  ;;  %v1393_v15 = vmin.u32 %v1168_v55, %v1166_v35  ;;  %v1196_v36 = vand.u32 3, %v1195_v61 }
 0x18b   : > { %1535 = vcosq.f32 %v1086_v48 }
 0x18c   : > { %1537 = vsinq.f32 %v1086_v48  ;;  %v1170_v50 = vclz %v1393_v15  ;;  %vm1201_vm4 = vcmp.eq.s32.totalorder %v1196_v36, 2  ;;  %vm1198_vm5 = vcmp.eq.s32.totalorder %v1196_v36, 0 }
 0x18d   : > { %vm1197_vm6 = vcmp.lt.s32.totalorder %v1196_v36, 2 }
 0x18e   : > { %v1394_v24 = vadd.s32 4294967294, %v1170_v50 }
 0x190   : > { %vm1395_vm13 = vcmp.lt.s32.totalorder %v1394_v24, 0 }
 0x191   : > { %v1173_v59 = vsel %vm1395_vm13, 0, %v1394_v24 }
 0x192   : > { %v1174_v51 = vsub.s32 32, %v1173_v59  ;;  %v1178_v44 = vsub.s32 4294967266, %v1173_v59  ;;  %v1175_v42 = vshll.u32 %v1166_v35, %v1173_v59 }
 0x194   : > { %v1176_v43 = vshrl.u32 %v1158_v32, %v1174_v51  ;;  %v1179_v5 = vadd.s32 127, %v1178_v44 }
 0x195   : > { %v1536_v60 = vpop.eup %1535 }
 0x196   : > { %v1538_v14 = vpop.eup %1537  ;;  %v1098_v57 = vxor.u32 2147483648, %v1536_v60  ;;  %v1177_v38 = vor.u32 %v1176_v43, %v1175_v42  ;;  %v1180_v46 = vshll.u32 %v1179_v5, 23 }
 0x197   : > { %v1095_v26 = vxor.u32 2147483648, %v1538_v14 }
 0x198   : > { %v1099_v8 = vsel %vm1097_vm14, %v1098_v57, %v1538_v14  ;;  %v1181_v21 = vor.u32 4788187, %v1180_v46  ;;  %v1184_v41 = vcvt.s32.f32 %v1177_v38 }
 0x199   : > { %v1096_v6 = vsel %vm1094_vm15, %v1536_v60, %v1095_v26 }
 0x19a   : > { %v1100_v34 = vsel %vm1093_vm0, %v1096_v6, %v1099_v8  ;;  %v1182_v22 = vand.u32 2147483647, %v1181_v21 }
 0x19b   : > { %v1101_v54 = vsel %vm1090_vm1, nan, %v1100_v34 }
 0x19c   : > { %v1185_v63 = vmul.f32 %v1184_v41, %v1182_v22  ;;  %v1212_v52 = vadd.f32 %v1101_v54, %v279_v10 }
 0x19e   : > { %v1186_v37 = vxor.u32 2147483648, %v1185_v63  ;;  %v1220_v56 = vmul.f32 %v1212_v52, %v1101_v54 }
 0x1a0   : > { %v1187_v53 = vsel %vm1104_vm2, %v1186_v37, %v1185_v63  ;;  %1228 = vst [vmem:[%s2542_s9 + $0x30] sm:$0xff] %v1220_v56 }
 0x1a1   : > { %v1190_v25 = vsel %vm1103_vm3, %v1864_v29, %v1187_v53 }
 0x1a2   : > { %1539 = vcosq.f32 %v1190_v25 }
 0x1a3   : > { %1541 = vsinq.f32 %v1190_v25 }
 0x1ac   : > { %v1540_v17 = vpop.eup %1539 }
 0x1ad   : > { %v1542_v19 = vpop.eup %1541  ;;  %v1202_v3 = vxor.u32 2147483648, %v1540_v17 }
 0x1ae   : > { %v1199_v27 = vxor.u32 2147483648, %v1542_v19 }
 0x1af   : > { %v1203_v18 = vsel %vm1201_vm4, %v1202_v3, %v1542_v19 }
 0x1b0   : > { %v1200_v31 = vsel %vm1198_vm5, %v1540_v17, %v1199_v27 }
 0x1b1   : > { %v1204_v9 = vsel %vm1197_vm6, %v1200_v31, %v1203_v18 }
 0x1b2   : > { %v1205_v49 = vsel %vm1194_vm7, nan, %v1204_v9 }
 0x1b3   : > { %v1213_v1 = vadd.f32 %v1205_v49, %v280_v12 }
 0x1b5   : > { %v1221_v40 = vmul.f32 %v1213_v1, %v1205_v49 }
 0x1b7   : > { %1229 = vst [vmem:[%s2542_s9 + $0x38] sm:$0xff] %v1221_v40 }
 0x1b8   : > { %1586 = shalt.err (!%p1583_p4)
}
 0x1b9   : > { %s1587_s6 = scalar_lea.hbm %s2666_s10, 1024  ;;  %s1591_s7 = scalar_lea.hbm %s2722_s4, 2048 }
 0x1ba   : > { %p1588_p7 = scmp.ne.s32.totalorder %s2666_s10, %s1587_s6  ;;  %p1592_p1 = scmp.lt.u32.totalorder %s2666_s10, %s2722_s4 }
 0x1bb   : > { %p1593_p3 = scmp.lt.u32.totalorder %s1591_s7, %s1587_s6  ;;  %p1595_p8 = scmp.lt.u32.totalorder %s1587_s6, %s2666_s10 }
 0x1bc   : > { %p1589_p10 = pnand %p1588_p7, %p2742_p11 }
 0x1bd   : > { %p1594_p9 = por %p1593_p3, %p1592_p1 }
 0x1be   : > { %p1590_p12 = pneg %p1589_p10 }
 0x1bf   : > { %p1596_p0 = por %p1595_p8, %p1594_p9 }
 0x1c1   : > { %p1597_p6 = pnand %p1596_p0, %p1590_p12 }
 0x1c3   : > { %1600 = shalt.err (!%p1597_p6)
}
 0x1c4   : > { %s1669_s11 = smov 256   ;;  %s1670_s24 = smov 16  }
 0x1c5   : > { %1438 = dma.vmem_to_hbm [thread:$0]  (%p2742_p11), %s2668_s21, 1024, %s2666_s10, %s1231_s26, %s1669_s11, %s1669_s11, %s1670_s24  }
 0x1c6 PF: > { %s1261_s25 = sand.u32 1, %s1635_s15   ;;  %p2743_p13 = scmp.ne.s32.totalorder %s2727_s30, 0 }
 0x1c7   : > { %p2744_p2 = scmp.ge.s32.totalorder %s1655_s20, 2  ;;  %s1262_s12 = scalar_lea.sflag [#allocation4], %s1261_s25 }
 0x1c9   : > { %p1445_p5 = pnand %p2744_p2, %p2743_p13 }
 0x1cb   : > { %1630 = dma.done.wait (!%p1445_p5), %s1262_s12, 1024  }
 0x1cc   : > { %1632 = vsyncadd (!%p1445_p5), %s1262_s12, 4294966272  ;;  %s20_s20 = sadd.s32 1, %s1655_s20   ;;  %s2745_s15 = smov %s1639_s16 }
 0x1cd   : > { %p17_p4 = scmp.ge.s32.totalorder %s20_s20, 4   ;;  %s2746_s16 = smov %s1643_s17 }
 0x1ce   : > { %s2747_s17 = smov %s1752_s29  ;;  %s2748_s18 = smov %s1651_s19 }
 0x1cf   : > { %s2749_s19 = smov %s2751_s23  ;;  %19 = sbr.rel (!%p17_p4) target bundleno = 6 (0x6), region = 84 }
 0x1d6   :  { %1267 = vsyncpa [#allocation3], 1 }
 0x1d7   :  { %1269 = vsyncpa [#allocation3 + $0x1], 1 }
 0x1d8   :  { %1270 = vsyncpa [#allocation4], 1 }
 0x1d9   :  { %1272 = vsyncpa [#allocation4 + $0x1], 1 }

</bundles_post_ra>
